<compile_context>
chip_gen: v7x
topology: tpu7x:2x2x1
jax: 0.10.0
libtpu: 0.0.40
codegen_flags: <defaults>
</compile_context>

<pallas_src>
import functools

import jax
import jax.numpy as jnp
from jax.experimental import pallas as pl
from jax.experimental.pallas import tpu as pltpu


# ---------------------------------------------------------------------------
# Fused kernel: Bt batch elements per grid step.
# ---------------------------------------------------------------------------
def _perceiver_block_kernel(t_ref, x_ref, lat_ref,
                            wada_ref, bada_ref,
                            wq_ref, bq_ref, wkv_ref, bkv_ref,
                            wo_ref, bo_ref, w1_ref, b1_ref, w2_ref, b2_ref,
                            o_ref, *, n_heads, eps=1e-6):
    f32 = jnp.float32
    w_dt = w1_ref.dtype

    Bt, Sl, D = lat_ref.shape
    Sx = x_ref.shape[1]
    Skv = Sl + Sx
    H = n_heads
    Dh = D // H
    inv_sqrt_dh = 1.0 / float(Dh) ** 0.5

    # ---- AdaLN modulations: one [Bt,T] @ [T,6D] dot, lane-sliced afterwards.
    t = t_ref[...].reshape(Bt, t_ref.shape[-1]).astype(f32)         # [Bt, T]
    t = t * jax.nn.sigmoid(t)                                       # SiLU (EUP, f32)
    mods = jnp.dot(t.astype(wada_ref.dtype), wada_ref[...],
                   preferred_element_type=f32) + bada_ref[...].astype(f32)   # [Bt, 6D]
    shift1, scale1 = mods[:, 0 * D:1 * D], mods[:, 1 * D:2 * D]
    shift2, scale2 = mods[:, 2 * D:3 * D], mods[:, 3 * D:4 * D]
    shiftF, scaleF = mods[:, 4 * D:5 * D], mods[:, 5 * D:6 * D]

    def adaln(v, shift, scale):            # v: [Bt,S,D]; shift/scale: [Bt,D]
        v = v.astype(f32)
        mu = jnp.mean(v, axis=-1, keepdims=True)
        var = jnp.mean(jnp.square(v - mu), axis=-1, keepdims=True)
        vn = (v - mu) * jax.lax.rsqrt(var + eps)
        return vn * (1.0 + scale[:, None, :]) + shift[:, None, :]

    latents = lat_ref[...].astype(f32)                               # [Bt, Sl, D]
    x = x_ref[...].astype(f32)                                       # [Bt, Sx, D]

    nl = adaln(latents, shift1, scale1)                              # ln_1(latents)
    nx = adaln(x, shift2, scale2)                                    # ln_2(x)
    kv = jnp.concatenate([nl, nx], axis=1)                           # [Bt, Skv, D]

    # ---- Fused full-width projections (cast activations once per tensor).
    nl_f = nl.reshape(Bt * Sl, D).astype(w_dt)
    kv_f = kv.reshape(Bt * Skv, D).astype(w_dt)

    q = jnp.dot(nl_f, wq_ref[...],
                preferred_element_type=f32) + bq_ref[...].astype(f32)        # [Bt*Sl, D]
    kvp = jnp.dot(kv_f, wkv_ref[...],
                  preferred_element_type=f32) + bkv_ref[...].astype(f32)     # [Bt*Skv, 2D]
    k = kvp[:, :D]
    v = kvp[:, D:]

    # ---- Attention: per-(batch, head) scores, one K^T transpose per step.
    kT = jnp.transpose(k)                                            # [D, Bt*Skv]
    ctx_rows = []
    for b in range(Bt):
        qb = q[b * Sl:(b + 1) * Sl]                                  # [Sl, D]
        vb = v[b * Skv:(b + 1) * Skv]                                # [Skv, D]
        heads = []
        for h in range(H):
            kh = kT[h * Dh:(h + 1) * Dh, b * Skv:(b + 1) * Skv]      # [Dh, Skv]
            s = jnp.dot(qb[:, h * Dh:(h + 1) * Dh], kh,
                        preferred_element_type=f32) * inv_sqrt_dh    # [Sl, Skv]
            s = s - jnp.max(s, axis=-1, keepdims=True)
            p = jnp.exp(s)
            p = p * pl.reciprocal(jnp.sum(p, axis=-1, keepdims=True),
                                  approx=True)                       # EUP divide
            heads.append(jnp.dot(p, vb[:, h * Dh:(h + 1) * Dh],
                                 preferred_element_type=f32))        # [Sl, Dh]
        ctx_rows.append(jnp.concatenate(heads, axis=-1))             # [Sl, D]
    ctx = jnp.concatenate(ctx_rows, axis=0)                          # [Bt*Sl, D]

    attn = (jnp.dot(ctx.astype(w_dt), wo_ref[...],
                    preferred_element_type=f32)
            + bo_ref[...].astype(f32)).reshape(Bt, Sl, D)
    lat = latents + attn                                             # residual 1

    # ---- Squared-ReLU MLP on ln_ff(lat).
    ff = adaln(lat, shiftF, scaleF).reshape(Bt * Sl, D).astype(w_dt)
    hdn = jnp.dot(ff, w1_ref[...],
                  preferred_element_type=f32) + b1_ref[...].astype(f32)      # [Bt*Sl, 4D]
    hdn = jnp.square(jnp.maximum(hdn, 0.0))
    mlp = (jnp.dot(hdn.astype(w_dt), w2_ref[...],
                   preferred_element_type=f32)
           + b2_ref[...].astype(f32)).reshape(Bt, Sl, D)

    o_ref[...] = (lat + mlp).astype(o_ref.dtype)


# ---------------------------------------------------------------------------
# Batch-block size selection.
# ---------------------------------------------------------------------------
def _pick_block_b(B, Sl, Sx, max_bt=8):
    # Keep flattened activations sublane-aligned; keep >= 2 parallel grid
    # steps when B >= 2 (v7x has 2 TensorCores per chip).
    if Sl % 8 != 0 or (Sl + Sx) % 8 != 0:
        return 1
    best = 1
    for bt in range(1, min(B, max_bt) + 1):
        if B % bt == 0 and B // bt >= 2:
            best = bt
    return best


# ---------------------------------------------------------------------------
# Wrapper
# ---------------------------------------------------------------------------
def perceiver_attention_block(x, latents, t_emb, kp, n_heads, block_b=None):
    """x: [B, Sx, D]; latents: [B, Sl, D]; t_emb: [B, T]. Returns [B, Sl, D]."""
    B, Sx, D = x.shape
    _, Sl, _ = latents.shape
    T = t_emb.shape[-1]
    d4 = kp["w1"].shape[-1]
    Skv = Sl + Sx

    bt = block_b if block_b is not None else _pick_block_b(B, Sl, Sx)
    assert B % bt == 0, (B, bt)
    grid = (B // bt,)

    t3 = t_emb.reshape(B, 1, T)   # keep last-two block dims == full dims

    weights = (kp["wada"], kp["bada"], kp["wq"], kp["bq"], kp["wkv"], kp["bkv"],
               kp["wo"], kp["bo"], kp["w1"], kp["b1"], kp["w2"], kp["b2"])

    def resident(arr):            # constant index_map -> DMA'd once, VMEM-resident
        nd = arr.ndim
        return pl.BlockSpec(arr.shape, lambda g, _n=nd: (0,) * _n)

    in_specs = [
        pl.BlockSpec((bt, 1, T), lambda g: (g, 0, 0)),    # t_emb
        pl.BlockSpec((bt, Sx, D), lambda g: (g, 0, 0)),   # x
        pl.BlockSpec((bt, Sl, D), lambda g: (g, 0, 0)),   # latents
    ] + [resident(w) for w in weights]
    out_specs = pl.BlockSpec((bt, Sl, D), lambda g: (g, 0, 0))

    # Advisory cost estimate so XLA overlaps this small kernel with neighbors.
    flops = B * (2 * T * 6 * D                    # adaln modulations
                 + 2 * Sl * D * D                 # Q projection
                 + 4 * Skv * D * D                # fused K/V projection
                 + 4 * Sl * Skv * D               # scores + context
                 + 2 * Sl * D * D                 # out projection
                 + 4 * Sl * D * d4)               # MLP
    transcendentals = B * (T + n_heads * Sl * (Skv + 1) + 2 * Sl + Sx)
    act_itemsize = jnp.dtype(latents.dtype).itemsize
    weight_bytes = int(sum(int(a.size) * a.dtype.itemsize for a in weights))
    io_bytes = int((t3.size + x.size + latents.size + B * Sl * D) * act_itemsize)

    # Explicit VMEM budget: resident weights (double-buffer-conservative),
    # double-buffered activation blocks, and the kernel's f32 intermediates.
    act_block_bytes = (bt * T + bt * Sx * D + 2 * bt * Sl * D) * act_itemsize
    inter_bytes = 4 * bt * ((Sl + Sx) * D * 6 + Sl * d4 * 2 + n_heads * Sl * Skv)
    vmem_needed = 2 * weight_bytes + 2 * act_block_bytes + inter_bytes + (4 << 20)
    vmem_limit = int(min(max(vmem_needed, 32 << 20), 64 << 20))

    kernel = functools.partial(_perceiver_block_kernel, n_heads=n_heads)
    return pl.pallas_call(
        kernel,
        out_shape=jax.ShapeDtypeStruct((B, Sl, D), latents.dtype),
        grid_spec=pl.GridSpec(grid=grid, in_specs=in_specs, out_specs=out_specs),
        compiler_params=pltpu.CompilerParams(
            dimension_semantics=("parallel",),
            vmem_limit_bytes=vmem_limit),
        cost_estimate=pl.CostEstimate(flops=int(flops),
                                      transcendentals=int(transcendentals),
                                      bytes_accessed=int(weight_bytes + io_bytes)),
    )(t3, x, latents, *weights)


# ---------------------------------------------------------------------------
# PyTorch-layout params -> kernel layout (pre-transposed / fused / stacked).
# Pass weight_dtype=jnp.bfloat16 for the production (DMA/VMEM-halving) config.
# ---------------------------------------------------------------------------
def prepare_kernel_params(p, d_model, weight_dtype=None):
    D = d_model

    def cast(a):
        return a.astype(weight_dtype) if weight_dtype is not None else a

    def ada_cols(W, b):            # W: [2D, T], b: [2D]  (PyTorch layout)
        Wt = W.T                   # [T, 2D]; chunk(2,-1): first D = shift, last D = scale
        return (Wt[:, :D], Wt[:, D:]), (b[:D], b[D:])

    (w1s, w1c), (b1s, b1c) = ada_cols(p["ln1_w"], p["ln1_b"])
    (w2s, w2c), (b2s, b2c) = ada_cols(p["ln2_w"], p["ln2_b"])
    (wfs, wfc), (bfs, bfc) = ada_cols(p["lnff_w"], p["lnff_b"])
    wada = jnp.concatenate([w1s, w1c, w2s, w2c, wfs, wfc], axis=1)   # [T, 6D]
    bada = jnp.concatenate([b1s, b1c, b2s, b2c, bfs, bfc]).reshape(1, 6 * D)

    Wq, Wk, Wv = (p["in_proj_w"][i * D:(i + 1) * D] for i in range(3))
    bq, bk, bv = (p["in_proj_b"][i * D:(i + 1) * D] for i in range(3))

    out = dict(
        wada=wada, bada=bada,
        wq=Wq.T, bq=bq.reshape(1, D),
        wkv=jnp.concatenate([Wk.T, Wv.T], axis=1),                   # [D, 2D]
        bkv=jnp.concatenate([bk, bv]).reshape(1, 2 * D),
        wo=p["out_proj_w"].T, bo=p["out_proj_b"].reshape(1, D),
        w1=p["c_fc_w"].T, b1=p["c_fc_b"].reshape(1, -1),
        w2=p["c_proj_w"].T, b2=p["c_proj_b"].reshape(1, -1),
    )
    return {k: cast(v) for k, v in out.items()}


# ---------------------------------------------------------------------------
# Pure-JAX reference (mirrors the PyTorch module math) for verification.
# ---------------------------------------------------------------------------
def _ada_layer_norm_ref(v, t_emb, W, b, eps=1e-6):
    D = v.shape[-1]
    emb = jax.nn.silu(t_emb) @ W.T + b               # [B, 2D]
    shift, scale = emb[:, None, :D], emb[:, None, D:]
    mu = v.mean(-1, keepdims=True)
    var = ((v - mu) ** 2).mean(-1, keepdims=True)
    return (v - mu) / jnp.sqrt(var + eps) * (1.0 + scale) + shift


def _mha_ref(q, kv, Wqkv, bqkv, Wo, bo, H):
    B, Sq, D = q.shape
    Skv = kv.shape[1]
    Dh = D // H
    Wq, Wk, Wv = Wqkv[:D], Wqkv[D:2 * D], Wqkv[2 * D:]
    bq, bk, bv = bqkv[:D], bqkv[D:2 * D], bqkv[2 * D:]
    Q = (q @ Wq.T + bq).reshape(B, Sq, H, Dh).transpose(0, 2, 1, 3)
    K = (kv @ Wk.T + bk).reshape(B, Skv, H, Dh).transpose(0, 2, 1, 3)
    V = (kv @ Wv.T + bv).reshape(B, Skv, H, Dh).transpose(0, 2, 1, 3)
    s = jnp.einsum('bhqd,bhkd->bhqk', Q, K) / jnp.sqrt(float(Dh))
    p = jax.nn.softmax(s, axis=-1)
    ctx = jnp.einsum('bhqk,bhkd->bhqd', p, V).transpose(0, 2, 1, 3).reshape(B, Sq, D)
    return ctx @ Wo.T + bo


def perceiver_block_ref(x, latents, t_emb, p, n_heads):
    nl = _ada_layer_norm_ref(latents, t_emb, p["ln1_w"], p["ln1_b"])
    nx = _ada_layer_norm_ref(x, t_emb, p["ln2_w"], p["ln2_b"])
    kv = jnp.concatenate([nl, nx], axis=1)
    latents = latents + _mha_ref(nl, kv, p["in_proj_w"], p["in_proj_b"],
                                 p["out_proj_w"], p["out_proj_b"], n_heads)
    ff = _ada_layer_norm_ref(latents, t_emb, p["lnff_w"], p["lnff_b"])
    h = ff @ p["c_fc_w"].T + p["c_fc_b"]
    h = jnp.square(jnp.maximum(h, 0.0))
    return latents + h @ p["c_proj_w"].T + p["c_proj_b"]


# ---------------------------------------------------------------------------
# Deterministic PyTorch-layout parameter init.
# (The real module zero-inits the AdaLN linears; random here to exercise math.)
# ---------------------------------------------------------------------------
def init_params(key, d_model, n_heads, t_dim, dtype=jnp.float32):
    D = d_model
    ks = iter(jax.random.split(key, 20))

    def lin(fan_in, shape_w, shape_b):
        bound = 1.0 / float(fan_in) ** 0.5
        w = jax.random.uniform(next(ks), shape_w, dtype, -bound, bound)
        b = jax.random.uniform(next(ks), shape_b, dtype, -bound, bound)
        return w, b

    p = {}
    p["ln1_w"], p["ln1_b"] = lin(t_dim, (2 * D, t_dim), (2 * D,))
    p["ln2_w"], p["ln2_b"] = lin(t_dim, (2 * D, t_dim), (2 * D,))
    p["lnff_w"], p["lnff_b"] = lin(t_dim, (2 * D, t_dim), (2 * D,))
    p["in_proj_w"], p["in_proj_b"] = lin(D, (3 * D, D), (3 * D,))
    p["out_proj_w"], p["out_proj_b"] = lin(D, (D, D), (D,))
    p["c_fc_w"], p["c_fc_b"] = lin(D, (4 * D, D), (4 * D,))
    p["c_proj_w"], p["c_proj_b"] = lin(4 * D, (D, 4 * D), (D,))
    return p


# ---------------------------------------------------------------------------
if __name__ == "__main__":
    jax.config.update("jax_default_matmul_precision", "highest")
    key = jax.random.PRNGKey(0)

    d_model, n_heads, t_dim = 32, 2, 64
    params = init_params(jax.random.fold_in(key, 99), d_model, n_heads, t_dim)
    kparams = prepare_kernel_params(params, d_model)   # f32 weights for tight check

    # First config: Bt=1 path; second config (B=8): Bt=4 batch-blocking path.
    for B, Sx, Sl in ((2, 16, 8), (8, 16, 8)):
        kx, kl, kt = jax.random.split(jax.random.fold_in(key, B), 3)
        x = jax.random.normal(kx, (B, Sx, d_model), jnp.float32)
        latents = jax.random.normal(kl, (B, Sl, d_model), jnp.float32)
        t_emb = jax.random.normal(kt, (B, t_dim), jnp.float32)

        out = jax.block_until_ready(
            perceiver_attention_block(x, latents, t_emb, kparams, n_heads))
        ref = perceiver_block_ref(x, latents, t_emb, params, n_heads)

        assert out.shape == (B, Sl, d_model)
        max_err = float(jnp.max(jnp.abs(out - ref)))
        # Tolerance slightly relaxed: softmax uses the EUP approximate reciprocal.
        assert jnp.allclose(out, ref, atol=5e-3, rtol=5e-3), (B, max_err)

    # TODO(synk): timestep_embedding=None is not supported (the PyTorch module
    # itself would crash on silu(None)); a t_emb must be provided.
    print("KERNEL_OK")
</pallas_src>

<mosaic_0001>
module attributes {stable_mosaic.version = 11 : i64} {
  func.func @_perceiver_block_kernel(%arg0: i32, %arg1: memref<1x1x64xf32, #tpu.memory_space<vmem>>, %arg2: memref<1x16x32xf32, #tpu.memory_space<vmem>>, %arg3: memref<1x8x32xf32, #tpu.memory_space<vmem>>, %arg4: memref<64x192xf32, #tpu.memory_space<vmem>>, %arg5: memref<1x192xf32, #tpu.memory_space<vmem>>, %arg6: memref<32x32xf32, #tpu.memory_space<vmem>>, %arg7: memref<1x32xf32, #tpu.memory_space<vmem>>, %arg8: memref<32x64xf32, #tpu.memory_space<vmem>>, %arg9: memref<1x64xf32, #tpu.memory_space<vmem>>, %arg10: memref<32x32xf32, #tpu.memory_space<vmem>>, %arg11: memref<1x32xf32, #tpu.memory_space<vmem>>, %arg12: memref<32x128xf32, #tpu.memory_space<vmem>>, %arg13: memref<1x128xf32, #tpu.memory_space<vmem>>, %arg14: memref<128x32xf32, #tpu.memory_space<vmem>>, %arg15: memref<1x32xf32, #tpu.memory_space<vmem>>, %arg16: memref<1x8x32xf32, #tpu.memory_space<vmem>>) attributes {dimension_semantics = [#tpu.dimension_semantics<parallel>], iteration_bounds = array<i64: 2>, scalar_prefetch = 0 : i64, scratch_operands = 0 : i64, tpu.core_type = #tpu.core_type<tc>, window_params = [{transform_indices = @transform_0, window_bounds = array<i64: 1, 1, 64>}, {transform_indices = @transform_1, window_bounds = array<i64: 1, 16, 32>}, {transform_indices = @transform_2, window_bounds = array<i64: 1, 8, 32>}, {pipeline_mode = #tpu.pipeline_mode<synchronous>, transform_indices = @transform_3, window_bounds = array<i64: 64, 192>}, {pipeline_mode = #tpu.pipeline_mode<synchronous>, transform_indices = @transform_4, window_bounds = array<i64: 1, 192>}, {pipeline_mode = #tpu.pipeline_mode<synchronous>, transform_indices = @transform_5, window_bounds = array<i64: 32, 32>}, {pipeline_mode = #tpu.pipeline_mode<synchronous>, transform_indices = @transform_6, window_bounds = array<i64: 1, 32>}, {pipeline_mode = #tpu.pipeline_mode<synchronous>, transform_indices = @transform_7, window_bounds = array<i64: 32, 64>}, {pipeline_mode = #tpu.pipeline_mode<synchronous>, transform_indices = @transform_8, window_bounds = array<i64: 1, 64>}, {pipeline_mode = #tpu.pipeline_mode<synchronous>, transform_indices = @transform_9, window_bounds = array<i64: 32, 32>}, {pipeline_mode = #tpu.pipeline_mode<synchronous>, transform_indices = @transform_10, window_bounds = array<i64: 1, 32>}, {pipeline_mode = #tpu.pipeline_mode<synchronous>, transform_indices = @transform_11, window_bounds = array<i64: 32, 128>}, {pipeline_mode = #tpu.pipeline_mode<synchronous>, transform_indices = @transform_12, window_bounds = array<i64: 1, 128>}, {pipeline_mode = #tpu.pipeline_mode<synchronous>, transform_indices = @transform_13, window_bounds = array<i64: 128, 32>}, {pipeline_mode = #tpu.pipeline_mode<synchronous>, transform_indices = @transform_14, window_bounds = array<i64: 1, 32>}, {transform_indices = @transform_15, window_bounds = array<i64: 1, 8, 32>}]} {
    %c0 = arith.constant 0 : index
    %c0_0 = arith.constant 0 : index
    %c0_1 = arith.constant 0 : index
    %0 = vector.load %arg1[%c0, %c0_0, %c0_1] : memref<1x1x64xf32, #tpu.memory_space<vmem>>, vector<1x1x64xf32>
    %1 = vector.shape_cast %0 : vector<1x1x64xf32> to vector<1x64xf32>
    %2 = arith.negf %1 : vector<1x64xf32>
    %3 = math.exp %2 : vector<1x64xf32>
    %cst = arith.constant 1.000000e+00 : f32
    %4 = vector.broadcast %cst : f32 to vector<1x64xf32>
    %5 = arith.addf %4, %3 : vector<1x64xf32>
    %6 = arith.divf %4, %5 : vector<1x64xf32>
    %7 = arith.mulf %1, %6 : vector<1x64xf32>
    %c0_2 = arith.constant 0 : index
    %c0_3 = arith.constant 0 : index
    %8 = vector.load %arg4[%c0_2, %c0_3] : memref<64x192xf32, #tpu.memory_space<vmem>>, vector<64x192xf32>
    %cst_4 = arith.constant dense<0.000000e+00> : vector<1x192xf32>
    %9 = tpu.matmul %7, %8, %cst_4 {dimension_numbers = #tpu.dot_dimension_numbers<[1], [0], [0], [1], [0, 0, 1, 1], [], []>, precision = #tpu.contract_precision<fp32>} : vector<1x64xf32>, vector<64x192xf32>, vector<1x192xf32> -> vector<1x192xf32>
    %c0_5 = arith.constant 0 : index
    %c0_6 = arith.constant 0 : index
    %10 = vector.load %arg5[%c0_5, %c0_6] : memref<1x192xf32, #tpu.memory_space<vmem>>, vector<1x192xf32>
    %11 = arith.addf %9, %10 : vector<1x192xf32>
    %12 = vector.extract_strided_slice %11 {offsets = [0, 0], sizes = [1, 32], strides = [1, 1]} : vector<1x192xf32> to vector<1x32xf32>
    %13 = vector.extract_strided_slice %11 {offsets = [0, 32], sizes = [1, 32], strides = [1, 1]} : vector<1x192xf32> to vector<1x32xf32>
    %14 = vector.extract_strided_slice %11 {offsets = [0, 64], sizes = [1, 32], strides = [1, 1]} : vector<1x192xf32> to vector<1x32xf32>
    %15 = vector.extract_strided_slice %11 {offsets = [0, 96], sizes = [1, 32], strides = [1, 1]} : vector<1x192xf32> to vector<1x32xf32>
    %16 = vector.extract_strided_slice %11 {offsets = [0, 128], sizes = [1, 32], strides = [1, 1]} : vector<1x192xf32> to vector<1x32xf32>
    %17 = vector.extract_strided_slice %11 {offsets = [0, 160], sizes = [1, 32], strides = [1, 1]} : vector<1x192xf32> to vector<1x32xf32>
    %c0_7 = arith.constant 0 : index
    %c0_8 = arith.constant 0 : index
    %c0_9 = arith.constant 0 : index
    %18 = vector.load %arg3[%c0_7, %c0_8, %c0_9] : memref<1x8x32xf32, #tpu.memory_space<vmem>>, vector<1x8x32xf32>
    %c0_10 = arith.constant 0 : index
    %c0_11 = arith.constant 0 : index
    %c0_12 = arith.constant 0 : index
    %19 = vector.load %arg2[%c0_10, %c0_11, %c0_12] : memref<1x16x32xf32, #tpu.memory_space<vmem>>, vector<1x16x32xf32>
    %cst_13 = arith.constant dense<0.000000e+00> : vector<1x8xf32>
    %20 = vector.multi_reduction <add>, %18, %cst_13 [2] : vector<1x8x32xf32> to vector<1x8xf32>
    %21 = vector.shape_cast %20 : vector<1x8xf32> to vector<1x8x1xf32>
    %cst_14 = arith.constant 3.200000e+01 : f32
    %22 = vector.broadcast %cst_14 : f32 to vector<1x8x1xf32>
    %23 = arith.divf %21, %22 : vector<1x8x1xf32>
    %24 = vector.broadcast %23 : vector<1x8x1xf32> to vector<1x8x32xf32>
    %25 = arith.subf %18, %24 : vector<1x8x32xf32>
    %26 = arith.mulf %25, %25 : vector<1x8x32xf32>
    %cst_15 = arith.constant dense<0.000000e+00> : vector<1x8xf32>
    %27 = vector.multi_reduction <add>, %26, %cst_15 [2] : vector<1x8x32xf32> to vector<1x8xf32>
    %28 = vector.shape_cast %27 : vector<1x8xf32> to vector<1x8x1xf32>
    %cst_16 = arith.constant 3.200000e+01 : f32
    %29 = vector.broadcast %cst_16 : f32 to vector<1x8x1xf32>
    %30 = arith.divf %28, %29 : vector<1x8x1xf32>
    %31 = vector.broadcast %23 : vector<1x8x1xf32> to vector<1x8x32xf32>
    %32 = arith.subf %18, %31 : vector<1x8x32xf32>
    %cst_17 = arith.constant 9.99999997E-7 : f32
    %33 = vector.broadcast %cst_17 : f32 to vector<1x8x1xf32>
    %34 = arith.addf %30, %33 : vector<1x8x1xf32>
    %35 = math.rsqrt %34 : vector<1x8x1xf32>
    %36 = vector.broadcast %35 : vector<1x8x1xf32> to vector<1x8x32xf32>
    %37 = arith.mulf %32, %36 : vector<1x8x32xf32>
    %38 = vector.shape_cast %13 : vector<1x32xf32> to vector<1x1x32xf32>
    %cst_18 = arith.constant 1.000000e+00 : f32
    %39 = vector.broadcast %cst_18 : f32 to vector<1x1x32xf32>
    %40 = arith.addf %39, %38 : vector<1x1x32xf32>
    %41 = vector.broadcast %40 : vector<1x1x32xf32> to vector<1x8x32xf32>
    %42 = arith.mulf %37, %41 : vector<1x8x32xf32>
    %43 = vector.shape_cast %12 : vector<1x32xf32> to vector<1x1x32xf32>
    %44 = vector.broadcast %43 : vector<1x1x32xf32> to vector<1x8x32xf32>
    %45 = arith.addf %42, %44 : vector<1x8x32xf32>
    %cst_19 = arith.constant dense<0.000000e+00> : vector<1x16xf32>
    %46 = vector.multi_reduction <add>, %19, %cst_19 [2] : vector<1x16x32xf32> to vector<1x16xf32>
    %47 = vector.shape_cast %46 : vector<1x16xf32> to vector<1x16x1xf32>
    %cst_20 = arith.constant 3.200000e+01 : f32
    %48 = vector.broadcast %cst_20 : f32 to vector<1x16x1xf32>
    %49 = arith.divf %47, %48 : vector<1x16x1xf32>
    %50 = vector.broadcast %49 : vector<1x16x1xf32> to vector<1x16x32xf32>
    %51 = arith.subf %19, %50 : vector<1x16x32xf32>
    %52 = arith.mulf %51, %51 : vector<1x16x32xf32>
    %cst_21 = arith.constant dense<0.000000e+00> : vector<1x16xf32>
    %53 = vector.multi_reduction <add>, %52, %cst_21 [2] : vector<1x16x32xf32> to vector<1x16xf32>
    %54 = vector.shape_cast %53 : vector<1x16xf32> to vector<1x16x1xf32>
    %cst_22 = arith.constant 3.200000e+01 : f32
    %55 = vector.broadcast %cst_22 : f32 to vector<1x16x1xf32>
    %56 = arith.divf %54, %55 : vector<1x16x1xf32>
    %57 = vector.broadcast %49 : vector<1x16x1xf32> to vector<1x16x32xf32>
    %58 = arith.subf %19, %57 : vector<1x16x32xf32>
    %cst_23 = arith.constant 9.99999997E-7 : f32
    %59 = vector.broadcast %cst_23 : f32 to vector<1x16x1xf32>
    %60 = arith.addf %56, %59 : vector<1x16x1xf32>
    %61 = math.rsqrt %60 : vector<1x16x1xf32>
    %62 = vector.broadcast %61 : vector<1x16x1xf32> to vector<1x16x32xf32>
    %63 = arith.mulf %58, %62 : vector<1x16x32xf32>
    %64 = vector.shape_cast %15 : vector<1x32xf32> to vector<1x1x32xf32>
    %cst_24 = arith.constant 1.000000e+00 : f32
    %65 = vector.broadcast %cst_24 : f32 to vector<1x1x32xf32>
    %66 = arith.addf %65, %64 : vector<1x1x32xf32>
    %67 = vector.broadcast %66 : vector<1x1x32xf32> to vector<1x16x32xf32>
    %68 = arith.mulf %63, %67 : vector<1x16x32xf32>
    %69 = vector.shape_cast %14 : vector<1x32xf32> to vector<1x1x32xf32>
    %70 = vector.broadcast %69 : vector<1x1x32xf32> to vector<1x16x32xf32>
    %71 = arith.addf %68, %70 : vector<1x16x32xf32>
    %72 = tpu.concatenate %45, %71 in 1 : vector<1x8x32xf32>, vector<1x16x32xf32> -> vector<1x24x32xf32>
    %73 = vector.shape_cast %45 : vector<1x8x32xf32> to vector<8x32xf32>
    %74 = vector.shape_cast %72 : vector<1x24x32xf32> to vector<24x32xf32>
    %c0_25 = arith.constant 0 : index
    %c0_26 = arith.constant 0 : index
    %75 = vector.load %arg6[%c0_25, %c0_26] : memref<32x32xf32, #tpu.memory_space<vmem>>, vector<32x32xf32>
    %cst_27 = arith.constant dense<0.000000e+00> : vector<8x32xf32>
    %76 = tpu.matmul %73, %75, %cst_27 {dimension_numbers = #tpu.dot_dimension_numbers<[1], [0], [0], [1], [0, 0, 1, 1], [], []>, precision = #tpu.contract_precision<fp32>} : vector<8x32xf32>, vector<32x32xf32>, vector<8x32xf32> -> vector<8x32xf32>
    %c0_28 = arith.constant 0 : index
    %c0_29 = arith.constant 0 : index
    %77 = vector.load %arg7[%c0_28, %c0_29] : memref<1x32xf32, #tpu.memory_space<vmem>>, vector<1x32xf32>
    %78 = vector.broadcast %77 : vector<1x32xf32> to vector<8x32xf32>
    %79 = arith.addf %76, %78 : vector<8x32xf32>
    %c0_30 = arith.constant 0 : index
    %c0_31 = arith.constant 0 : index
    %80 = vector.load %arg8[%c0_30, %c0_31] : memref<32x64xf32, #tpu.memory_space<vmem>>, vector<32x64xf32>
    %cst_32 = arith.constant dense<0.000000e+00> : vector<24x64xf32>
    %81 = tpu.matmul %74, %80, %cst_32 {dimension_numbers = #tpu.dot_dimension_numbers<[1], [0], [0], [1], [0, 0, 1, 1], [], []>, precision = #tpu.contract_precision<fp32>} : vector<24x32xf32>, vector<32x64xf32>, vector<24x64xf32> -> vector<24x64xf32>
    %c0_33 = arith.constant 0 : index
    %c0_34 = arith.constant 0 : index
    %82 = vector.load %arg9[%c0_33, %c0_34] : memref<1x64xf32, #tpu.memory_space<vmem>>, vector<1x64xf32>
    %83 = vector.broadcast %82 : vector<1x64xf32> to vector<24x64xf32>
    %84 = arith.addf %81, %83 : vector<24x64xf32>
    %85 = vector.extract_strided_slice %84 {offsets = [0, 0], sizes = [24, 32], strides = [1, 1]} : vector<24x64xf32> to vector<24x32xf32>
    %86 = vector.extract_strided_slice %84 {offsets = [0, 32], sizes = [24, 32], strides = [1, 1]} : vector<24x64xf32> to vector<24x32xf32>
    %87 = tpu.transpose %85, [1, 0] : vector<24x32xf32> -> vector<32x24xf32>
    %88 = vector.extract_strided_slice %87 {offsets = [0, 0], sizes = [16, 24], strides = [1, 1]} : vector<32x24xf32> to vector<16x24xf32>
    %89 = vector.extract_strided_slice %79 {offsets = [0, 0], sizes = [8, 16], strides = [1, 1]} : vector<8x32xf32> to vector<8x16xf32>
    %cst_35 = arith.constant dense<0.000000e+00> : vector<8x24xf32>
    %90 = tpu.matmul %89, %88, %cst_35 {dimension_numbers = #tpu.dot_dimension_numbers<[1], [0], [0], [1], [0, 0, 1, 1], [], []>, precision = #tpu.contract_precision<fp32>} : vector<8x16xf32>, vector<16x24xf32>, vector<8x24xf32> -> vector<8x24xf32>
    %cst_36 = arith.constant 2.500000e-01 : f32
    %91 = vector.broadcast %cst_36 : f32 to vector<8x24xf32>
    %92 = arith.mulf %90, %91 : vector<8x24xf32>
    %cst_37 = arith.constant dense<0xFF800000> : vector<8xf32>
    %93 = vector.multi_reduction <maximumf>, %92, %cst_37 [1] : vector<8x24xf32> to vector<8xf32>
    %94 = vector.shape_cast %93 : vector<8xf32> to vector<8x1xf32>
    %95 = vector.broadcast %94 : vector<8x1xf32> to vector<8x24xf32>
    %96 = arith.subf %92, %95 : vector<8x24xf32>
    %97 = math.exp %96 : vector<8x24xf32>
    %cst_38 = arith.constant dense<0.000000e+00> : vector<8xf32>
    %98 = vector.multi_reduction <add>, %97, %cst_38 [1] : vector<8x24xf32> to vector<8xf32>
    %99 = vector.shape_cast %98 : vector<8xf32> to vector<8x1xf32>
    %100 = tpu.reciprocal %99 {approx = true} : vector<8x1xf32> -> vector<8x1xf32>
    %101 = vector.broadcast %100 : vector<8x1xf32> to vector<8x24xf32>
    %102 = arith.mulf %97, %101 : vector<8x24xf32>
    %103 = vector.extract_strided_slice %86 {offsets = [0, 0], sizes = [24, 16], strides = [1, 1]} : vector<24x32xf32> to vector<24x16xf32>
    %cst_39 = arith.constant dense<0.000000e+00> : vector<8x16xf32>
    %104 = tpu.matmul %102, %103, %cst_39 {dimension_numbers = #tpu.dot_dimension_numbers<[1], [0], [0], [1], [0, 0, 1, 1], [], []>, precision = #tpu.contract_precision<fp32>} : vector<8x24xf32>, vector<24x16xf32>, vector<8x16xf32> -> vector<8x16xf32>
    %105 = vector.extract_strided_slice %87 {offsets = [16, 0], sizes = [16, 24], strides = [1, 1]} : vector<32x24xf32> to vector<16x24xf32>
    %106 = vector.extract_strided_slice %79 {offsets = [0, 16], sizes = [8, 16], strides = [1, 1]} : vector<8x32xf32> to vector<8x16xf32>
    %cst_40 = arith.constant dense<0.000000e+00> : vector<8x24xf32>
    %107 = tpu.matmul %106, %105, %cst_40 {dimension_numbers = #tpu.dot_dimension_numbers<[1], [0], [0], [1], [0, 0, 1, 1], [], []>, precision = #tpu.contract_precision<fp32>} : vector<8x16xf32>, vector<16x24xf32>, vector<8x24xf32> -> vector<8x24xf32>
    %cst_41 = arith.constant 2.500000e-01 : f32
    %108 = vector.broadcast %cst_41 : f32 to vector<8x24xf32>
    %109 = arith.mulf %107, %108 : vector<8x24xf32>
    %cst_42 = arith.constant dense<0xFF800000> : vector<8xf32>
    %110 = vector.multi_reduction <maximumf>, %109, %cst_42 [1] : vector<8x24xf32> to vector<8xf32>
    %111 = vector.shape_cast %110 : vector<8xf32> to vector<8x1xf32>
    %112 = vector.broadcast %111 : vector<8x1xf32> to vector<8x24xf32>
    %113 = arith.subf %109, %112 : vector<8x24xf32>
    %114 = math.exp %113 : vector<8x24xf32>
    %cst_43 = arith.constant dense<0.000000e+00> : vector<8xf32>
    %115 = vector.multi_reduction <add>, %114, %cst_43 [1] : vector<8x24xf32> to vector<8xf32>
    %116 = vector.shape_cast %115 : vector<8xf32> to vector<8x1xf32>
    %117 = tpu.reciprocal %116 {approx = true} : vector<8x1xf32> -> vector<8x1xf32>
    %118 = vector.broadcast %117 : vector<8x1xf32> to vector<8x24xf32>
    %119 = arith.mulf %114, %118 : vector<8x24xf32>
    %120 = vector.extract_strided_slice %86 {offsets = [0, 16], sizes = [24, 16], strides = [1, 1]} : vector<24x32xf32> to vector<24x16xf32>
    %cst_44 = arith.constant dense<0.000000e+00> : vector<8x16xf32>
    %121 = tpu.matmul %119, %120, %cst_44 {dimension_numbers = #tpu.dot_dimension_numbers<[1], [0], [0], [1], [0, 0, 1, 1], [], []>, precision = #tpu.contract_precision<fp32>} : vector<8x24xf32>, vector<24x16xf32>, vector<8x16xf32> -> vector<8x16xf32>
    %122 = tpu.concatenate %104, %121 in 1 : vector<8x16xf32>, vector<8x16xf32> -> vector<8x32xf32>
    %c0_45 = arith.constant 0 : index
    %c0_46 = arith.constant 0 : index
    %123 = vector.load %arg10[%c0_45, %c0_46] : memref<32x32xf32, #tpu.memory_space<vmem>>, vector<32x32xf32>
    %cst_47 = arith.constant dense<0.000000e+00> : vector<8x32xf32>
    %124 = tpu.matmul %122, %123, %cst_47 {dimension_numbers = #tpu.dot_dimension_numbers<[1], [0], [0], [1], [0, 0, 1, 1], [], []>, precision = #tpu.contract_precision<fp32>} : vector<8x32xf32>, vector<32x32xf32>, vector<8x32xf32> -> vector<8x32xf32>
    %c0_48 = arith.constant 0 : index
    %c0_49 = arith.constant 0 : index
    %125 = vector.load %arg11[%c0_48, %c0_49] : memref<1x32xf32, #tpu.memory_space<vmem>>, vector<1x32xf32>
    %126 = vector.broadcast %125 : vector<1x32xf32> to vector<8x32xf32>
    %127 = arith.addf %124, %126 : vector<8x32xf32>
    %128 = vector.shape_cast %127 : vector<8x32xf32> to vector<1x8x32xf32>
    %129 = arith.addf %18, %128 : vector<1x8x32xf32>
    %cst_50 = arith.constant dense<0.000000e+00> : vector<1x8xf32>
    %130 = vector.multi_reduction <add>, %129, %cst_50 [2] : vector<1x8x32xf32> to vector<1x8xf32>
    %131 = vector.shape_cast %130 : vector<1x8xf32> to vector<1x8x1xf32>
    %cst_51 = arith.constant 3.200000e+01 : f32
    %132 = vector.broadcast %cst_51 : f32 to vector<1x8x1xf32>
    %133 = arith.divf %131, %132 : vector<1x8x1xf32>
    %134 = vector.broadcast %133 : vector<1x8x1xf32> to vector<1x8x32xf32>
    %135 = arith.subf %129, %134 : vector<1x8x32xf32>
    %136 = arith.mulf %135, %135 : vector<1x8x32xf32>
    %cst_52 = arith.constant dense<0.000000e+00> : vector<1x8xf32>
    %137 = vector.multi_reduction <add>, %136, %cst_52 [2] : vector<1x8x32xf32> to vector<1x8xf32>
    %138 = vector.shape_cast %137 : vector<1x8xf32> to vector<1x8x1xf32>
    %cst_53 = arith.constant 3.200000e+01 : f32
    %139 = vector.broadcast %cst_53 : f32 to vector<1x8x1xf32>
    %140 = arith.divf %138, %139 : vector<1x8x1xf32>
    %141 = vector.broadcast %133 : vector<1x8x1xf32> to vector<1x8x32xf32>
    %142 = arith.subf %129, %141 : vector<1x8x32xf32>
    %cst_54 = arith.constant 9.99999997E-7 : f32
    %143 = vector.broadcast %cst_54 : f32 to vector<1x8x1xf32>
    %144 = arith.addf %140, %143 : vector<1x8x1xf32>
    %145 = math.rsqrt %144 : vector<1x8x1xf32>
    %146 = vector.broadcast %145 : vector<1x8x1xf32> to vector<1x8x32xf32>
    %147 = arith.mulf %142, %146 : vector<1x8x32xf32>
    %148 = vector.shape_cast %17 : vector<1x32xf32> to vector<1x1x32xf32>
    %cst_55 = arith.constant 1.000000e+00 : f32
    %149 = vector.broadcast %cst_55 : f32 to vector<1x1x32xf32>
    %150 = arith.addf %149, %148 : vector<1x1x32xf32>
    %151 = vector.broadcast %150 : vector<1x1x32xf32> to vector<1x8x32xf32>
    %152 = arith.mulf %147, %151 : vector<1x8x32xf32>
    %153 = vector.shape_cast %16 : vector<1x32xf32> to vector<1x1x32xf32>
    %154 = vector.broadcast %153 : vector<1x1x32xf32> to vector<1x8x32xf32>
    %155 = arith.addf %152, %154 : vector<1x8x32xf32>
    %156 = vector.shape_cast %155 : vector<1x8x32xf32> to vector<8x32xf32>
    %c0_56 = arith.constant 0 : index
    %c0_57 = arith.constant 0 : index
    %157 = vector.load %arg12[%c0_56, %c0_57] : memref<32x128xf32, #tpu.memory_space<vmem>>, vector<32x128xf32>
    %cst_58 = arith.constant dense<0.000000e+00> : vector<8x128xf32>
    %158 = tpu.matmul %156, %157, %cst_58 {dimension_numbers = #tpu.dot_dimension_numbers<[1], [0], [0], [1], [0, 0, 1, 1], [], []>, precision = #tpu.contract_precision<fp32>} : vector<8x32xf32>, vector<32x128xf32>, vector<8x128xf32> -> vector<8x128xf32>
    %c0_59 = arith.constant 0 : index
    %c0_60 = arith.constant 0 : index
    %159 = vector.load %arg13[%c0_59, %c0_60] : memref<1x128xf32, #tpu.memory_space<vmem>>, vector<1x128xf32>
    %160 = vector.broadcast %159 : vector<1x128xf32> to vector<8x128xf32>
    %161 = arith.addf %158, %160 : vector<8x128xf32>
    %cst_61 = arith.constant 0.000000e+00 : f32
    %162 = vector.broadcast %cst_61 : f32 to vector<8x128xf32>
    %163 = arith.maximumf %161, %162 : vector<8x128xf32>
    %164 = arith.mulf %163, %163 : vector<8x128xf32>
    %c0_62 = arith.constant 0 : index
    %c0_63 = arith.constant 0 : index
    %165 = vector.load %arg14[%c0_62, %c0_63] : memref<128x32xf32, #tpu.memory_space<vmem>>, vector<128x32xf32>
    %cst_64 = arith.constant dense<0.000000e+00> : vector<8x32xf32>
    %166 = tpu.matmul %164, %165, %cst_64 {dimension_numbers = #tpu.dot_dimension_numbers<[1], [0], [0], [1], [0, 0, 1, 1], [], []>, precision = #tpu.contract_precision<fp32>} : vector<8x128xf32>, vector<128x32xf32>, vector<8x32xf32> -> vector<8x32xf32>
    %c0_65 = arith.constant 0 : index
    %c0_66 = arith.constant 0 : index
    %167 = vector.load %arg15[%c0_65, %c0_66] : memref<1x32xf32, #tpu.memory_space<vmem>>, vector<1x32xf32>
    %168 = vector.broadcast %167 : vector<1x32xf32> to vector<8x32xf32>
    %169 = arith.addf %166, %168 : vector<8x32xf32>
    %170 = vector.shape_cast %169 : vector<8x32xf32> to vector<1x8x32xf32>
    %171 = arith.addf %129, %170 : vector<1x8x32xf32>
    %c0_67 = arith.constant 0 : index
    %c0_68 = arith.constant 0 : index
    %c0_69 = arith.constant 0 : index
    %172 = vector.load %arg16[%c0_67, %c0_68, %c0_69] : memref<1x8x32xf32, #tpu.memory_space<vmem>>, vector<1x8x32xf32>
    tpu.vector_store %arg16[%c0_67, %c0_68, %c0_69], %171 {strides = array<i32>} : memref<1x8x32xf32, #tpu.memory_space<vmem>>, vector<1x8x32xf32>,
    return
  }
  func.func @transform_0(%arg0: i32) -> (i32, i32, i32) {
    %c0_i32 = arith.constant 0 : i32
    %c0_i32_0 = arith.constant 0 : i32
    %c0_i32_1 = arith.constant 0 : i32
    return %arg0, %c0_i32, %c0_i32_0 : i32, i32, i32
  }
  func.func @transform_1(%arg0: i32) -> (i32, i32, i32) {
    %c0_i32 = arith.constant 0 : i32
    %c0_i32_0 = arith.constant 0 : i32
    %c0_i32_1 = arith.constant 0 : i32
    return %arg0, %c0_i32, %c0_i32_0 : i32, i32, i32
  }
  func.func @transform_2(%arg0: i32) -> (i32, i32, i32) {
    %c0_i32 = arith.constant 0 : i32
    %c0_i32_0 = arith.constant 0 : i32
    %c0_i32_1 = arith.constant 0 : i32
    return %arg0, %c0_i32, %c0_i32_0 : i32, i32, i32
  }
  func.func @transform_3(%arg0: i32) -> (i32, i32) {
    %c0_i32 = arith.constant 0 : i32
    %c0_i32_0 = arith.constant 0 : i32
    %c0_i32_1 = arith.constant 0 : i32
    return %c0_i32, %c0_i32_0 : i32, i32
  }
  func.func @transform_4(%arg0: i32) -> (i32, i32) {
    %c0_i32 = arith.constant 0 : i32
    %c0_i32_0 = arith.constant 0 : i32
    %c0_i32_1 = arith.constant 0 : i32
    return %c0_i32, %c0_i32_0 : i32, i32
  }
  func.func @transform_5(%arg0: i32) -> (i32, i32) {
    %c0_i32 = arith.constant 0 : i32
    %c0_i32_0 = arith.constant 0 : i32
    %c0_i32_1 = arith.constant 0 : i32
    return %c0_i32, %c0_i32_0 : i32, i32
  }
  func.func @transform_6(%arg0: i32) -> (i32, i32) {
    %c0_i32 = arith.constant 0 : i32
    %c0_i32_0 = arith.constant 0 : i32
    %c0_i32_1 = arith.constant 0 : i32
    return %c0_i32, %c0_i32_0 : i32, i32
  }
  func.func @transform_7(%arg0: i32) -> (i32, i32) {
    %c0_i32 = arith.constant 0 : i32
    %c0_i32_0 = arith.constant 0 : i32
    %c0_i32_1 = arith.constant 0 : i32
    return %c0_i32, %c0_i32_0 : i32, i32
  }
  func.func @transform_8(%arg0: i32) -> (i32, i32) {
    %c0_i32 = arith.constant 0 : i32
    %c0_i32_0 = arith.constant 0 : i32
    %c0_i32_1 = arith.constant 0 : i32
    return %c0_i32, %c0_i32_0 : i32, i32
  }
  func.func @transform_9(%arg0: i32) -> (i32, i32) {
    %c0_i32 = arith.constant 0 : i32
    %c0_i32_0 = arith.constant 0 : i32
    %c0_i32_1 = arith.constant 0 : i32
    return %c0_i32, %c0_i32_0 : i32, i32
  }
  func.func @transform_10(%arg0: i32) -> (i32, i32) {
    %c0_i32 = arith.constant 0 : i32
    %c0_i32_0 = arith.constant 0 : i32
    %c0_i32_1 = arith.constant 0 : i32
    return %c0_i32, %c0_i32_0 : i32, i32
  }
  func.func @transform_11(%arg0: i32) -> (i32, i32) {
    %c0_i32 = arith.constant 0 : i32
    %c0_i32_0 = arith.constant 0 : i32
    %c0_i32_1 = arith.constant 0 : i32
    return %c0_i32, %c0_i32_0 : i32, i32
  }
  func.func @transform_12(%arg0: i32) -> (i32, i32) {
    %c0_i32 = arith.constant 0 : i32
    %c0_i32_0 = arith.constant 0 : i32
    %c0_i32_1 = arith.constant 0 : i32
    return %c0_i32, %c0_i32_0 : i32, i32
  }
  func.func @transform_13(%arg0: i32) -> (i32, i32) {
    %c0_i32 = arith.constant 0 : i32
    %c0_i32_0 = arith.constant 0 : i32
    %c0_i32_1 = arith.constant 0 : i32
    return %c0_i32, %c0_i32_0 : i32, i32
  }
  func.func @transform_14(%arg0: i32) -> (i32, i32) {
    %c0_i32 = arith.constant 0 : i32
    %c0_i32_0 = arith.constant 0 : i32
    %c0_i32_1 = arith.constant 0 : i32
    return %c0_i32, %c0_i32_0 : i32, i32
  }
  func.func @transform_15(%arg0: i32) -> (i32, i32, i32) {
    %c0_i32 = arith.constant 0 : i32
    %c0_i32_0 = arith.constant 0 : i32
    %c0_i32_1 = arith.constant 0 : i32
    return %arg0, %c0_i32, %c0_i32_0 : i32, i32, i32
  }
}

</mosaic_0001>

<bundles_post_ra>
// kernel: tpu_custom_call.1
= control target key start
LH: loop header
LB: loop body
LE: loop exit
PB: predicated region body
PF: predicated region fallthrough
CT: control target
= control target key end

     0   :  { %s9885_s0 = inlined_call_operand.vmem [shape: f32[2,1,64], index: 0, kind: input, shape index: {}]   ;;  %s9886_s1 = inlined_call_operand.vmem [shape: f32[2,16,32], index: 1, kind: input, shape index: {}]   ;;  %s9887_s2 = inlined_call_operand.hbm [shape: f32[2,8,32], index: 2, kind: input, shape index: {}]   ;;  %s9888_s3 = inlined_call_operand.vmem [shape: f32[64,192], index: 3, kind: input, shape index: {}]   ;;  %s9889_s4 = inlined_call_operand.hbm [shape: f32[1,192], index: 4, kind: input, shape index: {}]   ;;  %s9890_s5 = inlined_call_operand.hbm [shape: f32[32,32], index: 5, kind: input, shape index: {}]   ;;  %s9891_s6 = inlined_call_operand.hbm [shape: f32[1,32], index: 6, kind: input, shape index: {}]   ;;  %s9892_s7 = inlined_call_operand.hbm [shape: f32[32,64], index: 7, kind: input, shape index: {}]   ;;  %s9893_s8 = inlined_call_operand.hbm [shape: f32[1,64], index: 8, kind: input, shape index: {}]   ;;  %s9894_s9 = inlined_call_operand.vmem [shape: f32[32,32], index: 9, kind: input, shape index: {}]   ;;  %s9895_s10 = inlined_call_operand.vmem [shape: f32[1,32], index: 10, kind: input, shape index: {}]   ;;  %s9896_s11 = inlined_call_operand.hbm [shape: f32[32,128], index: 11, kind: input, shape index: {}]   ;;  %s9897_s12 = inlined_call_operand.vmem [shape: f32[1,128], index: 12, kind: input, shape index: {}]   ;;  %s9898_s13 = inlined_call_operand.vmem [shape: f32[128,32], index: 13, kind: input, shape index: {}]   ;;  %s9899_s14 = inlined_call_operand.vmem [shape: f32[1,32], index: 14, kind: input, shape index: {}]   ;;  %s9900_s15 = inlined_call_operand.hbm [shape: f32[2,8,32], index: 15, kind: output, shape index: {}]  }
   0x1   :  { %9909 = sst [smem:[#allocation20_spill]] %s9889_s4 }
   0x2   :  { %9910 = sst [smem:[#allocation21_spill]] %s9890_s5 }
   0x3   :  { %9911 = sst [smem:[#allocation22_spill]] %s9894_s9 }
   0x4   :  { %9912 = sst [smem:[#allocation23_spill]] %s9895_s10 }
   0x5   :  { %9913 = sst [smem:[#allocation24_spill]] %s9897_s12 }
   0x6   :  { %9914 = sst [smem:[#allocation25_spill]] %s9898_s13 }
   0x7   :  { %9915 = sst [smem:[#allocation26_spill]] %s9899_s14 }
   0x8   :  { %9916 = sst [smem:[#allocation27_spill]] %s9900_s15 }
   0x9   :  { %20 = vsyncpa [#allocation3], 0 }
   0xa   :  { %22 = vsyncpa [#allocation3 + $0x1], 0 }
   0xb   :  { %23 = vsyncpa [#allocation6], 0 }
   0xc   :  { %24 = vsyncpa [#allocation9], 0 }
   0xd   :  { %25 = vsyncpa [#allocation12], 0 }
   0xe   :  { %26 = vsyncpa [#allocation4], 0 }
   0xf   :  { %28 = vsyncpa [#allocation4 + $0x1], 0  ;;  %s8464_s18 = smov 0   ;;  %s8466_s19 = smov 0  }
  0x10   :  { %s8468_s20 = smov 0   ;;  %s8470_s21 = smov 0  }
  0x11 LB: > { %s8365_s22 = smov [#allocation5]   ;;  %s8485_s24 = sadd.s32 4294967295, %s8363_s21   ;;  %s8363_s21 = sphi %s8470_s21, %s9949_s21   ;;  %s8359_s20 = sphi %s8468_s20, %s9948_s20   ;;  %s8355_s19 = sphi %s8466_s19, %s9947_s19   ;;  %s8351_s18 = sphi %s8464_s18, %s9946_s18  }
  0x12   : > { %s411_s23 = sshll.u32 %s8365_s22, 4  ;;  %p6298_p0 = scmp.ge.s32.totalorder %s8363_s21, 1  ;;  %s8490_s23 = int_to_ptr.vmem [resolvable:$true] %s411_s23 }
  0x13   : > { %p9904_p1 = scmp.eq.s32.totalorder %s8485_s24, 0  ;;  %p395_p2 = scmp.lt.s32.totalorder %s8363_s21, 3 }
  0x14   : > { %s8366_s26 = smov [#allocation8]   ;;  %s8367_s28 = smov [#allocation11]  }
  0x15   : > { %p8492_p3 = pnand %p6298_p0, %p395_p2  ;;  %s435_s27 = sshll.u32 %s8366_s26, 4  ;;  %s8499_s27 = int_to_ptr.vmem [resolvable:$true] %s435_s27 }
  0x16   : > { %s459_s29 = sshll.u32 %s8367_s28, 4  ;;  %s8368_s16 = smov [#allocation7]   ;;  %s8507_s29 = int_to_ptr.vmem [resolvable:$true] %s459_s29 }
  0x17   : > { %s9917_s25 = scalar_select %p8492_p3, 1, 0 }
  0x18   : > { %p7976_p5 = pneg %p8492_p3  ;;  %s8509_s17 = sshll.u32 %s8368_s16, 4  ;;  %s422_s17 = int_to_ptr.vmem [resolvable:$true] %s8509_s17 }
  0x19   : > { %s9919_s4 = sld [smem:[#allocation20_spill]] }
  0x1a   : > { %p8503_p6 = pnand %p7976_p5, %p9904_p1 }
  0x1c   : > { %p8519_p8 = pneg %p8503_p6 }
  0x1f   : > { %s8087_s14 = scalar_lea.hbm %s9919_s4, 32 }
  0x20   : > { %p8088_p7 = scmp.ne.s32.totalorder %s9919_s4, %s8087_s14  ;;  %p8094_p11 = scmp.lt.u32.totalorder %s8087_s14, %s9919_s4 }
  0x22   : > { %p8090_p9 = pnand %p8519_p8, %p8088_p7 }
  0x24   : > { %p8091_p10 = pneg %p8090_p9 }
  0x26   : > { %p8096_p12 = pnand %p8094_p11, %p8091_p10 }
  0x28   : > { %8099 = shalt.err (!%p8096_p12)
}
  0x29   : > { %s8100_s12 = scalar_lea.vmem %s8490_s23, 32  ;;  %p8108_p5 = scmp.lt.s32.totalorder %s8490_s23, %s8490_s23 }
  0x2a   : > { %p8101_p13 = scmp.ne.s32.totalorder %s8490_s23, %s8100_s12  ;;  %p8109_p4 = scmp.lt.s32.totalorder %s8100_s12, %s8100_s12 }
  0x2c   : > { %p8103_p0 = pnand %p8101_p13, %p8519_p8  ;;  %p8110_p7 = por %p8109_p4, %p8108_p5 }
  0x2e   : > { %p8104_p2 = pneg %p8103_p0 }
  0x30   : > { %p8111_p9 = pnand %p8110_p7, %p8104_p2 }
  0x32   : > { %8114 = shalt.err (!%p8111_p9)
}
  0x33   : > { %7979 = dma.hbm_to_vmem [thread:$0]  (!%p8503_p6), %s9919_s4, 32, %s8490_s23, [#allocation6]  }
  0x34   : > { %s8115_s26 = scalar_lea.hbm %s9891_s6, 16 }
  0x35   : > { %p8116_p10 = scmp.ne.s32.totalorder %s9891_s6, %s8115_s26  ;;  %p8122_p12 = scmp.lt.u32.totalorder %s8115_s26, %s9891_s6 }
  0x37   : > { %p8118_p4 = pnand %p8116_p10, %p8519_p8 }
  0x39   : > { %p8119_p11 = pneg %p8118_p4 }
  0x3b   : > { %p8124_p13 = pnand %p8122_p12, %p8119_p11 }
  0x3d   : > { %8127 = shalt.err (!%p8124_p13)
}
  0x3e   : > { %s8128_s23 = scalar_lea.vmem %s8499_s27, 16  ;;  %s8135_s10 = scalar_lea.vmem %s8499_s27, 32 }
  0x3f   : > { %p8129_p0 = scmp.ne.s32.totalorder %s8499_s27, %s8128_s23  ;;  %p8136_p7 = scmp.lt.s32.totalorder %s8499_s27, %s8499_s27 }
  0x40   : > { %p8137_p9 = scmp.lt.s32.totalorder %s8135_s10, %s8128_s23 }
  0x41   : > { %p8131_p2 = pnand %p8129_p0, %p8519_p8 }
  0x42   : > { %p8138_p10 = por %p8137_p9, %p8136_p7 }
  0x43   : > { %p8132_p5 = pneg %p8131_p2 }
  0x45   : > { %p8139_p4 = pnand %p8138_p10, %p8132_p5 }
  0x47   : > { %8142 = shalt.err (!%p8139_p4)
}
  0x48   : > { %7985 = dma.hbm_to_vmem [thread:$0]  (!%p8503_p6), %s9891_s6, 16, %s8499_s27, [#allocation9]  }
  0x49   : > { %s8143_s22 = scalar_lea.hbm %s9893_s8, 16 }
  0x4a   : > { %p8144_p11 = scmp.ne.s32.totalorder %s9893_s8, %s8143_s22  ;;  %p8150_p0 = scmp.lt.u32.totalorder %s8143_s22, %s9893_s8 }
  0x4c   : > { %p8146_p12 = pnand %p8144_p11, %p8519_p8 }
  0x4e   : > { %p8147_p13 = pneg %p8146_p12 }
  0x50   : > { %p8152_p2 = pnand %p8150_p0, %p8147_p13 }
  0x52   : > { %8155 = shalt.err (!%p8152_p2)
}
  0x53   : > { %s8156_s27 = scalar_lea.vmem %s8507_s29, 16  ;;  %s8163_s10 = scalar_lea.vmem %s8507_s29, 32 }
  0x54   : > { %p8157_p5 = scmp.ne.s32.totalorder %s8507_s29, %s8156_s27  ;;  %p8164_p10 = scmp.lt.s32.totalorder %s8507_s29, %s8507_s29 }
  0x55   : > { %p8165_p4 = scmp.lt.s32.totalorder %s8163_s10, %s8156_s27 }
  0x56   : > { %p8159_p7 = pnand %p8157_p5, %p8519_p8 }
  0x57   : > { %p8166_p11 = por %p8165_p4, %p8164_p10 }
  0x58   : > { %p8160_p9 = pneg %p8159_p7 }
  0x5a   : > { %p8167_p12 = pnand %p8166_p11, %p8160_p9 }
  0x5c   : > { %8170 = shalt.err (!%p8167_p12)
}
  0x5d   : > { %7991 = dma.hbm_to_vmem [thread:$0]  (!%p8503_p6), %s9893_s8, 16, %s8507_s29, [#allocation12]  }
  0x5e   : > { %s9921_s5 = sld [smem:[#allocation21_spill]] }
  0x64   : > { %s8171_s22 = scalar_lea.hbm %s9921_s5, 512 }
  0x65   : > { %p8172_p13 = scmp.ne.s32.totalorder %s9921_s5, %s8171_s22  ;;  %p8178_p5 = scmp.lt.u32.totalorder %s8171_s22, %s9921_s5 }
  0x67   : > { %p8174_p0 = pnand %p8172_p13, %p8519_p8 }
  0x69   : > { %p8175_p2 = pneg %p8174_p0 }
  0x6b   : > { %p8180_p7 = pnand %p8178_p5, %p8175_p2 }
  0x6d   : > { %8183 = shalt.err (!%p8180_p7)
}
  0x6e   : > { %s8184_s27 = scalar_lea.vmem %s422_s17, 512  ;;  %p8192_p11 = scmp.lt.s32.totalorder %s422_s17, %s422_s17 }
  0x6f   : > { %p8185_p9 = scmp.ne.s32.totalorder %s422_s17, %s8184_s27  ;;  %p8193_p12 = scmp.lt.s32.totalorder %s8184_s27, %s8184_s27 }
  0x71   : > { %p8187_p10 = pnand %p8185_p9, %p8519_p8  ;;  %p8194_p1 = por %p8193_p12, %p8192_p11 }
  0x73   : > { %p8188_p4 = pneg %p8187_p10 }
  0x75   : > { %p8195_p3 = pnand %p8194_p1, %p8188_p4 }
  0x77   : > { %8198 = shalt.err (!%p8195_p3)
}
  0x78   : > { %s8369_s29 = smov 128   ;;  %s8370_s10 = smov 8  }
  0x79   : > { %7982 = dma.hbm_to_vmem [thread:$0]  (!%p8503_p6), %s9921_s5, 512, %s422_s17, [#allocation6], %s8369_s29, %s8369_s29, %s8370_s10  }
  0x7a   : > { %s8371_s14 = smov [#allocation10]   ;;  %s8372_s22 = smov [#allocation13]  }
  0x7b   : > { %s445_s15 = sshll.u32 %s8371_s14, 4  ;;  %s475_s26 = sshll.u32 %s8372_s22, 4  ;;  %s446_s15 = int_to_ptr.vmem [resolvable:$true] %s445_s15  ;;  %s8610_s26 = int_to_ptr.vmem [resolvable:$true] %s475_s26 }
  0x7c   : > { %s8199_s23 = scalar_lea.hbm %s9892_s7, 512 }
  0x7d   : > { %p8200_p1 = scmp.ne.s32.totalorder %s9892_s7, %s8199_s23  ;;  %p8206_p0 = scmp.lt.u32.totalorder %s8199_s23, %s9892_s7 }
  0x7f   : > { %p8202_p3 = pnand %p8200_p1, %p8519_p8 }
  0x81   : > { %p8203_p13 = pneg %p8202_p3 }
  0x83   : > { %p8208_p2 = pnand %p8206_p0, %p8203_p13 }
  0x85   : > { %8211 = shalt.err (!%p8208_p2)
}
  0x86   : > { %s8212_s13 = scalar_lea.vmem %s446_s15, 512  ;;  %p8220_p10 = scmp.lt.s32.totalorder %s446_s15, %s446_s15 }
  0x87   : > { %p8213_p5 = scmp.ne.s32.totalorder %s446_s15, %s8212_s13  ;;  %p8221_p4 = scmp.lt.s32.totalorder %s8212_s13, %s8212_s13 }
  0x89   : > { %p8215_p7 = pnand %p8213_p5, %p8519_p8  ;;  %p8222_p11 = por %p8221_p4, %p8220_p10 }
  0x8b   : > { %p8216_p9 = pneg %p8215_p7 }
  0x8d   : > { %p8223_p12 = pnand %p8222_p11, %p8216_p9 }
  0x8f   : > { %8226 = shalt.err (!%p8223_p12)
}
  0x90   : > { %7988 = dma.hbm_to_vmem [thread:$0]  (!%p8503_p6), %s9892_s7, 512, %s446_s15, [#allocation9], %s8369_s29, %s8369_s29, %s8370_s10  }
  0x91   : > { %s8227_s12 = scalar_lea.hbm %s9896_s11, 512 }
  0x92   : > { %p8228_p1 = scmp.ne.s32.totalorder %s9896_s11, %s8227_s12  ;;  %p8234_p0 = scmp.lt.u32.totalorder %s8227_s12, %s9896_s11 }
  0x94   : > { %p8230_p3 = pnand %p8228_p1, %p8519_p8 }
  0x96   : > { %p8231_p13 = pneg %p8230_p3 }
  0x98   : > { %p8236_p2 = pnand %p8234_p0, %p8231_p13 }
  0x9a   : > { %8239 = shalt.err (!%p8236_p2)
}
  0x9b   : > { %s8240_s15 = scalar_lea.vmem %s8610_s26, 512  ;;  %p8248_p10 = scmp.lt.s32.totalorder %s8610_s26, %s8610_s26 }
  0x9c   : > { %p8241_p5 = scmp.ne.s32.totalorder %s8610_s26, %s8240_s15  ;;  %p8249_p4 = scmp.lt.s32.totalorder %s8240_s15, %s8240_s15 }
  0x9e   : > { %p8243_p7 = pnand %p8241_p5, %p8519_p8  ;;  %p8250_p11 = por %p8249_p4, %p8248_p10 }
  0xa0   : > { %p8244_p9 = pneg %p8243_p7 }
  0xa2   : > { %p8251_p12 = pnand %p8250_p11, %p8244_p9 }
  0xa4   : > { %8254 = shalt.err (!%p8251_p12)
}
  0xa5   : > { %7994 = dma.hbm_to_vmem [thread:$0]  (!%p8503_p6), %s9896_s11, 512, %s8610_s26, [#allocation12], %s8369_s29, %s8369_s29, %s8370_s10  }
  0xa6   : > { %s6297_s30 = sadd.s32 4294967294, %s8363_s21   ;;  %s8661_s28 = sadd.s32 1, %s8363_s21  }
  0xa7   : > { %s90_s14 = ssub.s32 %s8363_s21, %s8661_s28  ;;  %s93_s22 = sadd.s32 1, %s8359_s20 }
  0xa8   : > { %p91_p8 = scmp.eq.s32.totalorder %s90_s14, 0  ;;  %p100_p1 = scmp.ne.s32.totalorder %s8359_s20, %s8355_s19 }
  0xa9   : > { %p101_p3 = scmp.eq.s32.totalorder %s8363_s21, 0  ;;  %p106_p13 = scmp.ne.s32.totalorder %s8355_s19, %s8351_s18 }
  0xaa   : > { %s8672_s16 = scalar_select %p91_p8, %s8359_s20, %s93_s22  }
  0xab   : > { %p8674_p0 = por %p101_p3, %p100_p1  ;;  %p9923_p2 = scmp.eq.s32.totalorder %s8485_s24, 0 }
  0xac   : > { %p382_p5 = scmp.eq.s32.totalorder %s8485_s24, 1  ;;  %p388_p7 = scmp.eq.s32.totalorder %s6297_s30, 1 }
  0xad   : > { %p8680_p6 = por %p9923_p2, %p106_p13  ;;  %p8009_p9 = scmp.lt.s32.totalorder %s8363_s21, 2 }
  0xae   : > { %s512_s10 = sand.u32 1, %s8359_s20   ;;  %p8687_p10 = por %p382_p5, %p100_p1 }
  0xaf   : > { %p8691_p4 = por %p388_p7, %p106_p13  ;;  %s6306_s27 = sshll.u32 %s512_s10, 3 }
  0xb0   : > { %s9925_s26 = scalar_select %p8687_p10, 1, 0 }
  0xb1   : > { %s9926_s23 = scalar_select %p8691_p4, 1, 0 }
  0xb2   : > { %s6307_s9 = sshll.u32 %s8363_s21, 7  ;;  %s516_s4 = scalar_lea.vmem [#allocation2], %s6306_s27 }
  0xb3   : > { %s8699_s13 = scalar_lea.hbm %s9887_s2, %s6307_s9  ;;  %s523_s30 = sshll.u32 %s516_s4, 4  ;;  %s8701_s30 = int_to_ptr.vmem [resolvable:$true] %s523_s30 }
  0xb4   : > { %p8705_p11 = pnand %p8009_p9, %p8674_p0  ;;  %s513_s22 = scalar_lea.sflag [#allocation3], %s512_s10 }
  0xb5   : > { %s8255_s5 = scalar_lea.hbm %s8699_s13, 128  ;;  %s8260_s17 = scalar_lea.hbm %s9887_s2, 256 }
  0xb6   : > { %p8256_p12 = scmp.ne.s32.totalorder %s8699_s13, %s8255_s5  ;;  %p8257_p8 = pneg %p8705_p11 }
  0xb7   : > { %p8261_p13 = scmp.lt.u32.totalorder %s8699_s13, %s9887_s2  ;;  %p8262_p0 = scmp.lt.u32.totalorder %s8260_s17, %s8255_s5 }
  0xb8   : > { %p8258_p1 = pnand %p8257_p8, %p8256_p12  ;;  %p8264_p5 = scmp.lt.u32.totalorder %s8255_s5, %s8699_s13 }
  0xb9   : > { %p8263_p2 = por %p8262_p0, %p8261_p13 }
  0xba   : > { %p8259_p3 = pneg %p8258_p1 }
  0xbb   : > { %p8265_p7 = por %p8264_p5, %p8263_p2 }
  0xbd   : > { %p8266_p9 = pnand %p8265_p7, %p8259_p3 }
  0xbf   : > { %8269 = shalt.err (!%p8266_p9)
}
  0xc0   : > { %s8270_s10 = scalar_lea.vmem %s8701_s30, 128  ;;  %s8373_s4 = smov [#allocation2]  }
  0xc1   : > { %p8271_p12 = scmp.ne.s32.totalorder %s8701_s30, %s8270_s10  ;;  %s8275_s27 = sshll.u32 %s8373_s4, 4  ;;  %s8276_s27 = int_to_ptr.vmem [resolvable:$false] %s8275_s27 }
  0xc2   : > { %s8277_s9 = scalar_lea.vmem %s8276_s27, 256  ;;  %p8278_p10 = scmp.lt.s32.totalorder %s8701_s30, %s8276_s27 }
  0xc3   : > { %p8273_p1 = pnand %p8271_p12, %p8257_p8  ;;  %p8279_p13 = scmp.lt.s32.totalorder %s8277_s9, %s8270_s10 }
  0xc5   : > { %p8274_p4 = pneg %p8273_p1  ;;  %p8280_p0 = por %p8279_p13, %p8278_p10 }
  0xc7   : > { %p8281_p2 = pnand %p8280_p0, %p8274_p4 }
  0xc9   : > { %8284 = shalt.err (!%p8281_p2)
}
  0xca   : > { %7998 = dma.hbm_to_vmem [thread:$0]  (!%p8705_p11), %s8699_s13, 128, %s8701_s30, %s513_s22  }
  0xcb   : > { %p9928_p3 = scmp.ne.s32.totalorder %s9917_s25, 0 }
  0xcc   : > { %s8737_s5 = sand.u32 (!%p9928_p3), 1, %s8355_s19  }
  0xcd   : > { %532 = sbr.rel (%p9928_p3) target bundleno = 3835 (0xefb), region = 80  ;;  %s6309_s17 = sshll.u32 (!%p9928_p3), %s8737_s5, 3 }
  0xce   : > { %s535_s12 = scalar_lea.sflag (!%p9928_p3), [#allocation3], %s8737_s5  ;;  %s8743_s15 = scalar_lea.vmem (!%p9928_p3), [#allocation2], %s6309_s17 }
  0xd4   : > { %8330 = dma.done.wait (%p8680_p6), %s535_s12, 128  }
  0xd5   : > { %8332 = vsyncadd (%p8680_p6), %s535_s12, 4294967168  ;;  %p9929_p10 = scmp.eq.s32.totalorder %s8485_s24, 0 }
  0xd7   : > { %8334 = dma.done.wait (%p9929_p10), [#allocation6], 544   ;;  %p9930_p4 = pmov %p9929_p10 }
  0xd9   : > { %8336 = vsyncadd (%p9930_p4), [#allocation6], 4294966752  ;;  %p9931_p11 = pmov %p9930_p4 }
  0xda   : > { %p9932_p8 = pmov %p9930_p4 }
  0xdb   : > { %8338 = dma.done.wait (%p9931_p11), [#allocation9], 528  }
  0xdc   : > { %8340 = vsyncadd (%p9932_p8), [#allocation9], 4294966768  ;;  %p9933_p5 = pmov %p9930_p4 }
  0xdd   : > { %p9934_p7 = pmov %p9930_p4 }
  0xde   : > { %8342 = dma.done.wait (%p9933_p5), [#allocation12], 528  }
  0xdf   : > { %8344 = vsyncadd (%p9934_p7), [#allocation12], 4294966768  ;;  %p617_p6 = scmp.lt.s32.totalorder %s8485_s24, 1  ;;  %v8374_v0 = vmov 0.0   ;;  %vm1315_vm0 = vcmask 261120   ;;  %v8768_v1 = vld [vmem:[%s8743_s15] sm:$0xff] }
  0xe0   : > { %745 = vmatprep.mubr.f32.mxu0 %v8374_v0  ;;  %v634_v2 = vld [vmem:[%s9888_s3 + $0x8] sm:$0xff]  ;;  %v636_v3 = vld [vmem:[%s9888_s3 + $0x18] sm:$0xff]  ;;  %v1316_v4 = vsel %vm1315_vm0, %v8768_v1, 0.0  ;;  %v8781_v7 = vld [vmem:[%s9888_s3] sm:$0xff]  ;;  %vm661_vm1 = vcmask 523264   ;;  %vm8376_vm2 = vmmov 0  }
  0xe1   : > { %s8764_s25 = scalar_select %p617_p6, %s8485_s24, 1  ;;  %v665_v5 = vand.u32 4294901760, %v634_v2  ;;  %v669_v6 = vand.u32 4294901760, %v636_v3  ;;  %v8786_v8 = vld [vmem:[%s9888_s3 + $0x10] sm:$0xff]  ;;  %v8791_v9 = vld [vmem:[%s9888_s3 + $0x28] sm:$0xff]  ;;  %1317 = vadd.xlane.f32.xlu0 %v1316_v4  ;;  %v667_v10 = vand.u32 4294901760, %v8781_v7  ;;  %6668 = vmatprep.mubr.msk.f32.mxu1 %vm8376_vm2, %v8374_v0 }
  0xe2   : > { %v671_v11 = vand.u32 4294901760, %v8786_v8  ;;  %v8803_v12 = vld [vmem:[%s9888_s3 + $0x38] sm:$0xff]  ;;  %v673_v13 = vand.u32 4294901760, %v8791_v9  ;;  %v8809_v14 = vld [vmem:[%s9888_s3 + $0x20] sm:$0xff]  ;;  %v8814_v15 = vld [vmem:[%s9888_s3 + $0x30] sm:$0xff]  ;;  %s8379_s13 = smov 64  }
  0xe3   : > { %s6329_s29 = sshll.u32 %s8764_s25, 4  ;;  %s619_s14 = scalar_lea.vmem %s9885_s0, %s8764_s25  ;;  %v8820_v16 = vpack.c.bf16 %v669_v6, %v665_v5  ;;  %v677_v17 = vand.u32 4294901760, %v8803_v12  ;;  %v8826_v18 = vld [vmem:[%s9888_s3 + $0x48] sm:$0xff]  ;;  %v8831_v19 = vld [vmem:[%s9888_s3 + $0x58] sm:$0xff]  ;;  %v8836_v20 = vld [vmem:[%s9888_s3 + $0x40] sm:$0xff]  ;;  %v675_v25 = vand.u32 4294901760, %v8809_v14  ;;  %v8874_v34 = vsub.f32 %v634_v2, %v665_v5 }
  0xe4   : > { %s8796_s22 = scalar_lea.vmem %s9886_s1, %s6329_s29  ;;  %v8842_v21 = vpack.c.bf16 %v671_v11, %v667_v10  ;;  %v8847_v22 = vld [vmem:[%s9888_s3 + $0x50] sm:$0xff]  ;;  %v679_v26 = vand.u32 4294901760, %v8814_v15  ;;  %v625_v27 = vld [vmem:[%s619_s14] sm:$0x1]  ;;  %v681_v28 = vand.u32 4294901760, %v8826_v18  ;;  %v685_v29 = vand.u32 4294901760, %v8831_v19 }
  0xe5   : > { %v8850_v23 = vld [vmem:[%s8796_s22] sm:$0xff]  ;;  %7387 = vmatprep.subr.bf16.mxu0 %v8820_v16  ;;  %v8855_v24 = vpack.c.bf16 %v677_v17, %v673_v13  ;;  %v683_v30 = vand.u32 4294901760, %v8836_v20  ;;  %v687_v31 = vand.u32 4294901760, %v8847_v22  ;;  %v8867_v32 = vld [vmem:[%s9888_s3 + $0x68] sm:$0xff]  ;;  %v8872_v33 = vld [vmem:[%s9888_s3 + $0x78] sm:$0xff]  ;;  %v8876_v35 = vsub.f32 %v636_v3, %v669_v6  ;;  %s8378_s25 = smov 96  }
  0xe6   : > { %7389 = vmatpush1.bf16.msra.mxu0 %v8842_v21  ;;  %v8879_v36 = vpack.c.bf16 %v679_v26, %v675_v25  ;;  %v1345_v37 = vsel %vm1315_vm0, %v8850_v23, 0.0  ;;  %v8886_v38 = vld [vmem:[%s9888_s3 + $0x60] sm:$0xff]  ;;  %v8891_v39 = vld [vmem:[%s9888_s3 + $0x70] sm:$0xff]  ;;  %v8894_v40 = vld [vmem:[%s8796_s22 + $0x8] sm:$0xff]  ;;  %v8896_v41 = vpack.c.bf16 %v685_v29, %v681_v28  ;;  %v6319_v43 = vmul.f32 -1.442695, %v625_v27 }
  0xe7   : > { %7391 = vmatprep.subr.bf16.mxu0 %v8855_v24  ;;  %1346 = vadd.xlane.f32.xlu0 %v1345_v37  ;;  %v8902_v42 = vpack.c.bf16 %v687_v31, %v683_v30  ;;  %v689_v44 = vand.u32 4294901760, %v8867_v32  ;;  %v693_v45 = vand.u32 4294901760, %v8872_v33  ;;  %v691_v46 = vand.u32 4294901760, %v8886_v38  ;;  %s8377_s22 = smov 32   ;;  %s8380_s30 = smov 112  }
  0xe8   : > { %v695_v47 = vand.u32 4294901760, %v8891_v39  ;;  %v1348_v48 = vsel %vm1315_vm0, %v8894_v40, 0.0  ;;  %8066 = vpow2.f32 %v6319_v43  ;;  %v759_v49 = vand.u32 4294901760, %v8874_v34  ;;  %s8381_s10 = smov 80   ;;  %s9937_s14 = sld [smem:[#allocation22_spill]] }
  0xe9   : > { %1349 = vadd.xlane.f32.xlu1 %v1348_v48  ;;  %v771_v50 = vand.u32 4294901760, %v8876_v35  ;;  %v8914_v51 = vpack.c.bf16 %v693_v45, %v689_v44  ;;  %v8926_v60 = vsub.f32 %v8781_v7, %v667_v10  ;;  %v8931_v61 = vsub.f32 %v8786_v8, %v671_v11  ;;  %s9938_s9 = sld [smem:[#allocation23_spill]]  ;;  %s9939_s29 = sld [smem:[#allocation25_spill]] }
  0xea   : > { %7393 = vmatpush1.bf16.msra.mxu0 %v8879_v36  ;;  %v760_v52 = vsub.f32 %v8874_v34, %v759_v49  ;;  %v8919_v54 = vpack.c.bf16 %v695_v47, %v691_v46  ;;  %v8936_v62 = vsub.f32 %v8791_v9, %v673_v13  ;;  %v8939_v63 = vsub.f32 %v8803_v12, %v677_v17  ;;  %s9941_s4 = sld [smem:[#allocation26_spill]]  ;;  %s6326_s27 = sshll.u32 %s8485_s24, 7 }
  0xeb   : > { %7395 = vmatprep.subr.bf16.mxu0 %v8896_v41  ;;  %v772_v53 = vsub.f32 %v8876_v35, %v771_v50  ;;  %v8941_v2 = vpack.c.bf16 %v771_v50, %v759_v49  ;;  %v8944_v3 = vsub.f32 %v8809_v14, %v675_v25  ;;  %v8947_v4 = vsub.f32 %v8814_v15, %v679_v26  ;;  %s6136_s24 = scalar_lea.sflag [#allocation4], %s8737_s5  ;;  %p9943_p12 = scmp.ne.s32.totalorder %s9925_s26, 0 }
  0xec   : > { %v761_v55 = vand.u32 4294901760, %v760_v52  ;;  %v765_v5 = vand.u32 4294901760, %v8926_v60  ;;  %v777_v6 = vand.u32 4294901760, %v8931_v61  ;;  %v8952_v7 = vsub.f32 %v8826_v18, %v681_v28 }
  0xed   : > { %v773_v56 = vand.u32 4294901760, %v772_v53  ;;  %v783_v8 = vand.u32 4294901760, %v8936_v62  ;;  %v795_v9 = vand.u32 4294901760, %v8939_v63  ;;  %v8957_v11 = vsub.f32 %v8831_v19, %v685_v29 }
  0xee   : > { %7397 = vmatpush1.bf16.msra.mxu0 %v8902_v42  ;;  %v789_v12 = vand.u32 4294901760, %v8944_v3  ;;  %v766_v14 = vsub.f32 %v8926_v60, %v765_v5  ;;  %v778_v15 = vsub.f32 %v8931_v61, %v777_v6  ;;  %v801_v17 = vand.u32 4294901760, %v8947_v4 }
  0xef   : > { %7399 = vmatprep.subr.bf16.mxu0 %v8914_v51  ;;  %v7402_v57 = vpack.c.bf16 %v773_v56, %v761_v55  ;;  %v784_v18 = vsub.f32 %v8936_v62, %v783_v8  ;;  %v796_v19 = vsub.f32 %v8939_v63, %v795_v9  ;;  %v807_v25 = vand.u32 4294901760, %v8952_v7 }
  0xf0   : > { %v8977_v26 = vsub.f32 %v8836_v20, %v683_v30  ;;  %v8985_v29 = vsub.f32 %v8867_v32, %v689_v44  ;;  %v8988_v37 = vsub.f32 %v8872_v33, %v693_v45  ;;  %v819_v48 = vand.u32 4294901760, %v8957_v11 }
  0xf1   : > { %v767_v49 = vand.u32 4294901760, %v766_v14  ;;  %v779_v50 = vand.u32 4294901760, %v778_v15  ;;  %v790_v20 = vsub.f32 %v8944_v3, %v789_v12  ;;  %v797_v32 = vand.u32 4294901760, %v796_v19 }
  0xf2   : > { %7401 = vmatpush1.bf16.msra.mxu0 %v8919_v54  ;;  %v8067_v58 = vpop.eup %8066  ;;  %v808_v33 = vsub.f32 %v8952_v7, %v807_v25  ;;  %v9006_v44 = vsub.f32 %v8886_v38, %v691_v46  ;;  %v9009_v45 = vsub.f32 %v8891_v39, %v695_v47  ;;  %v813_v52 = vand.u32 4294901760, %v8977_v26 }
  0xf3   : > { %7403 = vmatprep.subr.bf16.mxu0 %v7402_v57  ;;  %v629_v59 = vadd.f32 1.0, %v8067_v58  ;;  %v820_v56 = vsub.f32 %v8957_v11, %v819_v48  ;;  %v9907_v57 = vand.u32 4294901760, %v8985_v29  ;;  %v843_v58 = vand.u32 4294901760, %v8988_v37 }
  0xf4   : > { %v7404_v46 = vpack.c.bf16 %v779_v50, %v767_v49  ;;  %v837_v15 = vand.u32 4294901760, %v9006_v44  ;;  %vm2469_vm3 = vcmask 130048   ;;  %vm2955_vm4 = vcmask 195584  }
  0xf5   : > { %8068 = vrcp.f32 %v629_v59  ;;  %v791_v59 = vand.u32 4294901760, %v790_v20  ;;  %v832_v49 = vsub.f32 %v8985_v29, %v9907_v57  ;;  %v844_v50 = vsub.f32 %v8988_v37, %v843_v58 }
  0xf7   : > { %v845_v57 = vand.u32 4294901760, %v844_v50  ;;  %v7456_v50 = vpack.c.bf16 %v801_v17, %v789_v12  ;;  %v649_v12 = vld [vmem:[#allocation5] sm:$0x3] }
  0xff   : > { %v8069_v10 = vpop.eup %8068 }
 0x100   : > { %v632_v13 = vmul.f32 %v8069_v10, %v625_v27  ;;  %v8982_v27 = vsub.f32 %v8847_v22, %v687_v31  ;;  %v802_v22 = vsub.f32 %v8947_v4, %v801_v17  ;;  %v785_v31 = vand.u32 4294901760, %v784_v18 }
 0x101   : > { %v809_v10 = vand.u32 4294901760, %v808_v33  ;;  %v9908_v18 = vand.u32 4294901760, %v9009_v45 }
 0x102   : > { %v663_v28 = vsel %vm661_vm1, %v632_v13, 0  ;;  %v825_v53 = vand.u32 4294901760, %v8982_v27  ;;  %v803_v38 = vand.u32 4294901760, %v802_v22  ;;  %v7406_v47 = vpack.c.bf16 %v797_v32, %v785_v31 }
 0x103   : > { %v8990_v43 = vand.u32 4294901760, %v663_v28  ;;  %v814_v13 = vsub.f32 %v8977_v26, %v813_v52  ;;  %v838_v32 = vsub.f32 %v9006_v44, %v837_v15  ;;  %v850_v33 = vsub.f32 %v9009_v45, %v9908_v18 }
 0x104   : > { %v826_v14 = vsub.f32 %v8982_v27, %v825_v53  ;;  %v7408_v20 = vpack.c.bf16 %v803_v38, %v791_v59  ;;  %v7420_v18 = vpack.c.bf16 %v8931_v61, %v8926_v60  ;;  %v7458_v60 = vpack.c.bf16 %v819_v48, %v807_v25 }
 0x105   : > { %v9000_v30 = vsub.f32 %v663_v28, %v8990_v43  ;;  %v821_v28 = vand.u32 4294901760, %v820_v56  ;;  %v815_v22 = vand.u32 4294901760, %v814_v13  ;;  %v839_v59 = vand.u32 4294901760, %v838_v32 }
 0x106   : > { %v827_v31 = vand.u32 4294901760, %v826_v14  ;;  %v851_v38 = vand.u32 4294901760, %v850_v33  ;;  %v7418_v14 = vpack.c.bf16 %v8876_v35, %v8874_v34  ;;  %v7426_v34 = vpack.c.bf16 %v8957_v11, %v8952_v7 }
 0x107   : > { %v748_v55 = vand.u32 4294901760, %v9000_v30  ;;  %v7410_v56 = vpack.c.bf16 %v821_v28, %v809_v10  ;;  %v7428_v35 = vpack.c.bf16 %v8982_v27, %v8977_v26  ;;  %v7430_v10 = vpack.c.bf16 %v8988_v37, %v8985_v29  ;;  %v1382_v27 = vld [vmem:[#allocation7] sm:$0xff] }
 0x108   : > { %v7416_v13 = vpack.c.bf16 %v851_v38, %v839_v59  ;;  %v7452_v28 = vpack.c.bf16 %v777_v6, %v765_v5  ;;  %v7460_v61 = vpack.c.bf16 %v825_v53, %v813_v52  ;;  %v651_v11 = vlaneseq  ;;  %v1384_v53 = vld [vmem:[#allocation7 + $0x10] sm:$0xff] }
 0x109   : > { %v749_v39 = vsub.f32 %v9000_v30, %v748_v55  ;;  %v1397_v37 = vand.u32 4294901760, %v1382_v27  ;;  %v8375_v52 = vmov 0.0|0.0  }
 0x10a   : > { %7482 = vmatprep.subr.bf16.mxu1 %v8375_v52 }
 0x10b   : > { %v750_v19 = vand.u32 4294901760, %v749_v39  ;;  %v833_v39 = vand.u32 4294901760, %v832_v49  ;;  %v7454_v49 = vpack.c.bf16 %v795_v9, %v783_v8 }
 0x10d   : > { %751 = vmatmul.mubr.f32.vlgmr.msra.gmra.mrb[0].mxu0 %v750_v19  ;;  %v7412_v19 = vpack.c.bf16 %v827_v31, %v815_v22 }
 0x10e   : > { %7405 = vmatpush1.bf16.msra.mxu0 %v7404_v46  ;;  %901 = vmatprep.mubr.f32.mxu0 %v8374_v0  ;;  %v7414_v46 = vpack.c.bf16 %v845_v57, %v833_v39  ;;  %v7424_v57 = vpack.c.bf16 %v8947_v4, %v8944_v3 }
 0x10f   : > { %7407 = vmatprep.subr.bf16.mxu0 %v7406_v47  ;;  %v7422_v47 = vpack.c.bf16 %v8939_v63, %v8936_v62  ;;  %v9935_v62 = vand.u32 4294901760, %v8985_v29  ;;  %v1383_v29 = vld [vmem:[#allocation7 + $0x8] sm:$0xff] }
 0x111   : > { %v7462_v63 = vpack.c.bf16 %v843_v58, %v9935_v62 }
 0x112   : > { %7409 = vmatpush1.bf16.msra.mxu0 %v7408_v20  ;;  %v1403_v20 = vand.u32 4294901760, %v1384_v53 }
 0x113   : > { %7411 = vmatprep.subr.bf16.mxu0 %v7410_v56 }
 0x116   : > { %7413 = vmatpush1.bf16.msra.mxu0 %v7412_v19  ;;  %v9151_v19 = vsub.f32 %v1384_v53, %v1403_v20 }
 0x117   : > { %7415 = vmatprep.subr.bf16.mxu0 %v7414_v46 }
 0x11a   : > { %7417 = vmatpush1.bf16.msra.mxu0 %v7416_v13 }
 0x11b   : > { %7419 = vmatprep.subr.bf16.mxu0 %v7418_v14  ;;  %v1492_v14 = vand.u32 4294901760, %v9151_v19 }
 0x11d   : > { %903 = vmatmul.mubr.f32.vlgmr.msra.gmra.mrb[0].mxu0 %v8990_v43 }
 0x11e   : > { %7421 = vmatpush1.bf16.msra.mxu0 %v7420_v18  ;;  %1005 = vmatprep.mubr.f32.mxu0 %v8374_v0  ;;  %v7432_v18 = vpack.c.bf16 %v9009_v45, %v9006_v44 }
 0x11f   : > { %7423 = vmatprep.subr.bf16.mxu0 %v7422_v47 }
 0x122   : > { %7425 = vmatpush1.bf16.msra.mxu0 %v7424_v57 }
 0x123   : > { %7427 = vmatprep.subr.bf16.mxu0 %v7426_v34 }
 0x126   : > { %7429 = vmatpush1.bf16.msra.mxu0 %v7428_v35  ;;  %v1493_v35 = vsub.f32 %v9151_v19, %v1492_v14 }
 0x127   : > { %7431 = vmatprep.subr.bf16.mxu0 %v7430_v10 }
 0x12a   : > { %7433 = vmatpush1.bf16.msra.mxu0 %v7432_v18 }
 0x12b   : > { %7435 = vmatprep.subr.bf16.mxu0 %v8820_v16 }
 0x12d   : > { %1008 = vmatmul.mubr.f32.vlgmr.msra.gmra.mrb[0].mxu0 %v9000_v30  ;;  %v9137_v30 = vsub.f32 %v1382_v27, %v1397_v37 }
 0x12e   : > { %7437 = vmatpush1.bf16.msra.mxu0 %v8842_v21  ;;  %1094 = vmatprep.mubr.f32.mxu0 %v8374_v0 }
 0x12f   : > { %7439 = vmatprep.subr.bf16.mxu0 %v8855_v24  ;;  %v1478_v31 = vand.u32 4294901760, %v9137_v30 }
 0x131   : > { %v1479_v46 = vsub.f32 %v9137_v30, %v1478_v31 }
 0x132   : > { %7441 = vmatpush1.bf16.msra.mxu0 %v8879_v36 }
 0x133   : > { %7443 = vmatprep.subr.bf16.mxu0 %v8896_v41  ;;  %v1480_v57 = vand.u32 4294901760, %v1479_v46 }
 0x136   : > { %7445 = vmatpush1.bf16.msra.mxu0 %v8902_v42 }
 0x137   : > { %7447 = vmatprep.subr.bf16.mxu0 %v8914_v51 }
 0x13a   : > { %7449 = vmatpush1.bf16.msra.mxu0 %v8919_v54 }
 0x13b   : > { %7451 = vmatprep.subr.bf16.mxu0 %v8941_v2  ;;  %v9936_v2 = vand.u32 4294901760, %v9009_v45 }
 0x13d   : > { %1098 = vmatmul.mubr.f32.vlgmr.msra.gmra.mrb[0].mxu0 %v748_v55  ;;  %v7464_v3 = vpack.c.bf16 %v9936_v2, %v837_v15  ;;  %v1385_v55 = vld [vmem:[#allocation7 + $0x18] sm:$0xff] }
 0x13e   : > { %7453 = vmatpush1.bf16.msra.mxu0 %v7452_v28  ;;  %1216 = vmatprep.mubr.f32.mxu0 %v8374_v0  ;;  %v1406_v22 = vand.u32 4294901760, %v1385_v55 }
 0x13f   : > { %7455 = vmatprep.subr.bf16.mxu0 %v7454_v49  ;;  %v1494_v49 = vand.u32 4294901760, %v1493_v35 }
 0x140   : > { %v9149_v39 = vpack.c.bf16 %v1406_v22, %v1403_v20  ;;  %v1498_v59 = vsub.f32 %v1385_v55, %v1406_v22  ;;  %v1883_v22 = vld [vmem:[#allocation10 + $0x10] sm:$0xff] }
 0x142   : > { %7457 = vmatpush1.bf16.msra.mxu0 %v7456_v50  ;;  %v1499_v47 = vand.u32 4294901760, %v1498_v59  ;;  %v7498_v62 = vpack.c.bf16 %v1498_v59, %v9151_v19 }
 0x143   : > { %7459 = vmatprep.subr.bf16.mxu0 %v7458_v60 }
 0x144   : > { %v1500_v10 = vsub.f32 %v1498_v59, %v1499_v47  ;;  %v7510_v2 = vpack.c.bf16 %v1499_v47, %v1492_v14 }
 0x146   : > { %7461 = vmatpush1.bf16.msra.mxu0 %v7460_v61  ;;  %v1501_v50 = vand.u32 4294901760, %v1500_v10 }
 0x147   : > { %7463 = vmatprep.subr.bf16.mxu0 %v7462_v63 }
 0x148   : > { %v7492_v60 = vpack.c.bf16 %v1501_v50, %v1494_v49 }
 0x14a   : > { %7465 = vmatpush1.bf16.msra.mxu0 %v7464_v3 }
 0x14b   : > { %7467 = vmatprep.subr.bf16.mxu0 %v8820_v16 }
 0x14d   : > { %1218 = vmatmul.mubr.f32.vlgmr.msra.gmra.mrb[0].mxu0 %v8990_v43 }
 0x14e   : > { %7469 = vmatpush1.bf16.msra.mxu0 %v8842_v21  ;;  %1304 = vmatprep.mubr.f32.mxu0 %v8374_v0 }
 0x14f   : > { %7471 = vmatprep.subr.bf16.mxu0 %v8855_v24 }
 0x152   : > { %7473 = vmatpush1.bf16.msra.mxu0 %v8879_v36 }
 0x153   : > { %7475 = vmatprep.subr.bf16.mxu0 %v8896_v41 }
 0x156   : > { %7477 = vmatpush1.bf16.msra.mxu0 %v8902_v42 }
 0x157   : > { %7479 = vmatprep.subr.bf16.mxu0 %v8914_v51 }
 0x15a   : > { %7481 = vmatpush1.bf16.msra.mxu0 %v8919_v54 }
 0x15b   : > { %7557 = vmatprep.subr.bf16.mxu0 %v8375_v52 }
 0x15d   : > { %1306 = vmatmul.mubr.f32.vlgmr.msra.gmra.mrb[0].mxu0 %v8990_v43  ;;  %v1400_v43 = vand.u32 4294901760, %v1383_v29 }
 0x15e   : > { %6843 = vmatprep.mubr.msk.f32.mxu0 %vm8376_vm2, %v8374_v0 }
 0x15f   : > { %v9135_v48 = vpack.c.bf16 %v1400_v43, %v1397_v37  ;;  %v9139_v44 = vsub.f32 %v1383_v29, %v1400_v43 }
 0x161   : > { %7484 = vmatpush3.bf16.msra.mxu1 %v9135_v48  ;;  %v1485_v33 = vand.u32 4294901760, %v9139_v44  ;;  %v7495_v61 = vpack.c.bf16 %v9139_v44, %v9137_v30 }
 0x162   : > { %7485 = vmatprep.subr.bf16.mxu1 %v8375_v52 }
 0x163   : > { %v1486_v13 = vsub.f32 %v9139_v44, %v1485_v33  ;;  %v7507_v63 = vpack.c.bf16 %v1485_v33, %v1478_v31  ;;  %v1881_v44 = vld [vmem:[#allocation10] sm:$0xff] }
 0x165   : > { %7487 = vmatpush3.bf16.msra.mxu1 %v9149_v39  ;;  %v1487_v34 = vand.u32 4294901760, %v1486_v13 }
 0x166   : > { %7488 = vmatprep.subr.bf16.mxu1 %v8375_v52 }
 0x167   : > { %v7489_v28 = vpack.c.bf16 %v1487_v34, %v1480_v57 }
 0x16e   : > { %v1318_v16 = vpop.xlane.xlu0 %1317 }
 0x16f   : > { %v1320_v4 = vmul.f32 0.03125, %v1318_v16 }
 0x171   : > { %v9115_v21 = vsub.f32 %v8768_v1, %v1320_v4 }
 0x173   : > { %v1322_v24 = vmul.f32 %v9115_v21, %v9115_v21 }
 0x174   : > { %v1347_v5 = vpop.xlane.xlu0 %1346 }
 0x175   : > { %v1323_v36 = vsel %vm1315_vm0, %v1322_v24, 0.0  ;;  %v1351_v41 = vmul.f32 0.03125, %v1347_v5 }
 0x176   : > { %1324 = vadd.xlane.f32.xlu1 %v1323_v36  ;;  %v1350_v51 = vpop.xlane.xlu1 %1349 }
 0x177   : > { %v9121_v42 = vsub.f32 %v8850_v23, %v1351_v41  ;;  %v1352_v54 = vmul.f32 0.03125, %v1350_v51  ;;  %v652_v23 = vshrl.u32 %v651_v11, 7 }
 0x179   : > { %v1355_v6 = vmul.f32 %v9121_v42, %v9121_v42  ;;  %v9126_v7 = vsub.f32 %v8894_v40, %v1352_v54  ;;  %v657_v17 = vsub.s32 1, %v652_v23  ;;  %v9132_v26 = vsub.s32 0, %v652_v23 }
 0x17b   : > { %v1357_v1 = vsel %vm1315_vm0, %v1355_v6, 0.0  ;;  %v1356_v8 = vmul.f32 %v9126_v7, %v9126_v7  ;;  %v658_v25 = vrot.slane %v649_v12, %v657_v17  ;;  %v654_v40 = vrot.slane %v649_v12, %v9132_v26 }
 0x17c   : > { %1358 = vadd.xlane.f32.xlu1 %v1357_v1 }
 0x17d   : > { %v1360_v9 = vsel %vm1315_vm0, %v1356_v8, 0.0 }
 0x180   : > { %1361 = vadd.xlane.f32.xlu1 %v1360_v9 }
 0x203   : > { %v1325_v3 = vpop.xlane.xlu1 %1324 }
 0x204   : > { %v1326_v16 = vmul.f32 0.03125, %v1325_v3 }
 0x206   : > { %v1327_v4 = vadd.f32 1e-06, %v1326_v16 }
 0x208   : > { %8070 = vrsqrt.f32 %v1327_v4 }
 0x209   : > { %v1359_v11 = vpop.xlane.xlu1 %1358 }
 0x20d   : > { %v1362_v12 = vpop.xlane.xlu1 %1361 }
 0x212   : > { %v8071_v24 = vpop.eup %8070 }
 0x213   : > { %v1329_v5 = vmul.f32 %v8071_v24, %v9115_v21  ;;  %v1363_v21 = vmul.f32 0.03125, %v1359_v11 }
 0x215   : > { %v1365_v17 = vadd.f32 1e-06, %v1363_v21 }
 0x217   : > { %8072 = vrsqrt.f32 %v1365_v17  ;;  %v6320_v17 = vld [vmem:[#allocation8] ss:$0 sm:$0xff] }
 0x221   : > { %v8073_v29 = vpop.eup %8072 }
 0x222   : > { %v1369_v37 = vmul.f32 %v8073_v29, %v9121_v42  ;;  %v1884_v42 = vld [vmem:[#allocation10 + $0x18] sm:$0xff] }
 0x223   : > { %v1908_v46 = vand.u32 4294901760, %v1884_v42 }
 0x225   : > { %v9218_v13 = vsub.f32 %v1884_v42, %v1908_v46 }
 0x230   : > { %v1307_v45 = vpop.f32.mrb[0].mxu0 }
 0x231   : > { %v7842_v58 = vadd.f32 %v1307_v45, %v654_v40  ;;  %v1309_v15 = vpop.f32.mrb[1].mxu0  ;;  %v1882_v45 = vld [vmem:[#allocation10 + $0x8] sm:$0xff] }
 0x232   : > { %v9145_v32 = vadd.f32 %v1309_v15, %v658_v25  ;;  %v1364_v25 = vmul.f32 0.03125, %v1362_v12  ;;  %v1899_v15 = vand.u32 4294901760, %v1881_v44  ;;  %v1902_v20 = vand.u32 4294901760, %v1882_v45 }
 0x233   : > { %v1330_v56 = vadd.f32 1.0, %v7842_v58  ;;  %v1343_v18 = vrot.slane %v7842_v58, %v9132_v26 }
 0x234   : > { %v1366_v27 = vadd.f32 1e-06, %v1364_v25  ;;  %v9206_v33 = vsub.f32 %v1881_v44, %v1899_v15  ;;  %v9226_v35 = vpack.c.bf16 %v1902_v20, %v1899_v15 }
 0x235   : > { %v1334_v38 = vrot.slane %v1330_v56, %v9132_v26  ;;  %v9208_v56 = vsub.f32 %v1882_v45, %v1902_v20 }
 0x236   : > { %8074 = vrsqrt.f32 %v1366_v27  ;;  %v2000_v14 = vand.u32 4294901760, %v9206_v33  ;;  %v6321_v27 = vld [vmem:[#allocation11] ss:$0 sm:$0xff] }
 0x237   : > { %1371 = vrot.lane.b32.xlu1 %v1334_v38, %s8377_s22  ;;  %1336 = vrot.lane.b32.xlu0 %v1334_v38, %s8378_s25  ;;  %v1905_v38 = vand.u32 4294901760, %v1883_v22  ;;  %v2007_v47 = vand.u32 4294901760, %v9208_v56  ;;  %v7531_v11 = vpack.c.bf16 %v9208_v56, %v9206_v33  ;;  %s9942_s22 = sld [smem:[#allocation27_spill]] }
 0x239   : > { %v2008_v10 = vsub.f32 %v9208_v56, %v2007_v47 }
 0x23b   : > { %1377 = vrot.lane.b32.xlu0 %v1343_v18, %s8379_s13  ;;  %s9940_s13 = sld [smem:[#allocation24_spill]] }
 0x240   : > { %v8075_v43 = vpop.eup %8074 }
 0x241   : > { %v1370_v55 = vmul.f32 %v8075_v43, %v9126_v7  ;;  %v9216_v7 = vsub.f32 %v1883_v22, %v1905_v38 }
 0x2a9   : > { %v1337_v36 = vpop.permute.xlu0 %1336  ;;  %v1372_v40 = vpop.permute.xlu1 %1371 }
 0x2aa   : > { %v1339_v41 = vmul.f32 %v1337_v36, %v1329_v5  ;;  %v1374_v53 = vmul.f32 %v1372_v40, %v1369_v37  ;;  %v1375_v31 = vmul.f32 %v1372_v40, %v1370_v55 }
 0x2ac   : > { %v1344_v51 = vadd.f32 %v1343_v18, %v1339_v41  ;;  %v2014_v18 = vand.u32 4294901760, %v9216_v7 }
 0x2ad   : > { %v1378_v30 = vpop.permute.xlu0 %1377 }
 0x2ae   : > { %v1394_v54 = vsel %vm1315_vm0, %v1344_v51, 0  ;;  %v1380_v58 = vadd.f32 %v1378_v30, %v1374_v53  ;;  %v1381_v19 = vadd.f32 %v1378_v30, %v1375_v31 }
 0x2af   : > { %v9171_v6 = vand.u32 4294901760, %v1394_v54 }
 0x2b0   : > { %v1893_v59 = vsel %vm1315_vm0, %v1380_v58, 0  ;;  %v1896_v34 = vsel %vm1315_vm0, %v1381_v19, 0 }
 0x2b1   : > { %v9174_v1 = vsub.f32 %v1394_v54, %v9171_v6  ;;  %v9222_v57 = vand.u32 4294901760, %v1893_v59  ;;  %v9240_v50 = vand.u32 4294901760, %v1896_v34 }
 0x2b3   : > { %v9177_v8 = vand.u32 4294901760, %v9174_v1  ;;  %v9238_v49 = vsub.f32 %v1893_v59, %v9222_v57 }
 0x2b5   : > { %v1468_v9 = vsub.f32 %v9174_v1, %v9177_v8  ;;  %v1979_v3 = vand.u32 4294901760, %v9238_v49 }
 0x2b7   : > { %v9181_v23 = vand.u32 4294901760, %v1468_v9  ;;  %v1980_v5 = vsub.f32 %v9238_v49, %v1979_v3 }
 0x2b9   : > { %6669 = vmatmul.mubr.f32.vlgmr.msra.gmra.mrb[0].mxu1 %v9181_v23  ;;  %v1981_v51 = vand.u32 4294901760, %v1980_v5 }
 0x2ba   : > { %7490 = vmatpush3.bf16.msra.mxu1 %v7489_v28  ;;  %6679 = vmatprep.mubr.msk.f32.mxu1 %vm8376_vm2, %v8374_v0  ;;  %v2021_v28 = vand.u32 4294901760, %v9218_v13 }
 0x2bb   : > { %7491 = vmatprep.subr.bf16.mxu1 %v8375_v52 }
 0x2bc   : > { %v7546_v21 = vpack.c.bf16 %v2021_v28, %v2014_v18 }
 0x2be   : > { %7493 = vmatpush3.bf16.msra.mxu1 %v7492_v60 }
 0x2bf   : > { %7494 = vmatprep.subr.bf16.mxu1 %v8375_v52 }
 0x2c1   : > { %6680 = vmatmul.mubr.f32.vlgmr.msra.gmra.mrb[0].mxu1 %v9171_v6 }
 0x2c2   : > { %7496 = vmatpush3.bf16.msra.mxu1 %v7495_v61  ;;  %6690 = vmatprep.mubr.msk.f32.mxu1 %vm8376_vm2, %v8374_v0  ;;  %v2009_v61 = vand.u32 4294901760, %v2008_v10 }
 0x2c3   : > { %7497 = vmatprep.subr.bf16.mxu1 %v8375_v52 }
 0x2c6   : > { %7499 = vmatpush3.bf16.msra.mxu1 %v7498_v62  ;;  %v2015_v62 = vsub.f32 %v9216_v7, %v2014_v18 }
 0x2c7   : > { %7500 = vmatprep.subr.bf16.mxu1 %v8375_v52 }
 0x2c8   : > { %v2016_v4 = vand.u32 4294901760, %v2015_v62 }
 0x2c9   : > { %6691 = vmatmul.mubr.f32.vlgmr.msra.gmra.mrb[0].mxu1 %v9174_v1 }
 0x2ca   : > { %7502 = vmatpush3.bf16.msra.mxu1 %v9135_v48  ;;  %6701 = vmatprep.mubr.msk.f32.mxu1 %vm8376_vm2, %v8374_v0 }
 0x2cb   : > { %7503 = vmatprep.subr.bf16.mxu1 %v8375_v52 }
 0x2ce   : > { %7505 = vmatpush3.bf16.msra.mxu1 %v9149_v39 }
 0x2cf   : > { %7506 = vmatprep.subr.bf16.mxu1 %v8375_v52 }
 0x2d1   : > { %6702 = vmatmul.mubr.f32.vlgmr.msra.gmra.mrb[0].mxu1 %v9177_v8 }
 0x2d2   : > { %7508 = vmatpush3.bf16.msra.mxu1 %v7507_v63  ;;  %6712 = vmatprep.mubr.msk.f32.mxu1 %vm8376_vm2, %v8374_v0  ;;  %v2022_v63 = vsub.f32 %v9218_v13, %v2021_v28 }
 0x2d3   : > { %7509 = vmatprep.subr.bf16.mxu1 %v8375_v52 }
 0x2d4   : > { %v2023_v24 = vand.u32 4294901760, %v2022_v63 }
 0x2d6   : > { %7511 = vmatpush3.bf16.msra.mxu1 %v7510_v2  ;;  %v1988_v2 = vsub.f32 %v1896_v34, %v9240_v50  ;;  %v7528_v41 = vpack.c.bf16 %v2023_v24, %v2016_v4 }
 0x2d7   : > { %7512 = vmatprep.subr.bf16.mxu1 %v8375_v52 }
 0x2d8   : > { %v1989_v36 = vand.u32 4294901760, %v1988_v2 }
 0x2d9   : > { %6713 = vmatmul.mubr.f32.vlgmr.msra.gmra.mrb[0].mxu1 %v9171_v6 }
 0x2da   : > { %7514 = vmatpush3.bf16.msra.mxu1 %v9135_v48  ;;  %6723 = vmatprep.mubr.msk.f32.mxu1 %vm8376_vm2, %v8374_v0  ;;  %v2001_v48 = vsub.f32 %v9206_v33, %v2000_v14  ;;  %v1990_v54 = vsub.f32 %v1988_v2, %v1989_v36 }
 0x2db   : > { %7515 = vmatprep.subr.bf16.mxu1 %v8375_v52 }
 0x2dc   : > { %v2002_v60 = vand.u32 4294901760, %v2001_v48  ;;  %v1991_v9 = vand.u32 4294901760, %v1990_v54 }
 0x2de   : > { %7517 = vmatpush3.bf16.msra.mxu1 %v9149_v39  ;;  %v9244_v39 = vpack.c.bf16 %v1908_v46, %v1905_v38  ;;  %v7525_v16 = vpack.c.bf16 %v2009_v61, %v2002_v60 }
 0x2df   : > { %7518 = vmatprep.subr.bf16.mxu1 %v8375_v52 }
 0x2e1   : > { %6724 = vmatmul.mubr.f32.vlgmr.msra.gmra.mrb[0].mxu1 %v9171_v6 }
 0x2e2   : > { %7520 = vmatpush3.bf16.msra.mxu1 %v9226_v35  ;;  %6734 = vmatprep.mubr.msk.f32.mxu1 %vm8376_vm2, %v8374_v0 }
 0x2e3   : > { %7521 = vmatprep.subr.bf16.mxu1 %v8375_v52 }
 0x2e6   : > { %7523 = vmatpush3.bf16.msra.mxu1 %v9244_v39 }
 0x2e7   : > { %7524 = vmatprep.subr.bf16.mxu1 %v8375_v52 }
 0x2e9   : > { %6735 = vmatmul.mubr.f32.vlgmr.msra.gmra.mrb[2].mxu1 %v9181_v23  ;;  %v7534_v23 = vpack.c.bf16 %v9218_v13, %v9216_v7 }
 0x2ea   : > { %7526 = vmatpush3.bf16.msra.mxu1 %v7525_v16  ;;  %6737 = vmatprep.mubr.msk.f32.mxu1 %vm8376_vm2, %v8374_v0 }
 0x2eb   : > { %7527 = vmatprep.subr.bf16.mxu1 %v8375_v52 }
 0x2ed   : > { %6738 = vmatmul.mubr.f32.gmra.mrb[4].mxu1 %v1981_v51 }
 0x2ee   : > { %6740 = vmatprep.mubr.msk.f32.mxu1 %vm8376_vm2, %v8374_v0  ;;  %7529 = vmatpush3.bf16.msra.mxu1 %v7528_v41 }
 0x2ef   : > { %7530 = vmatprep.subr.bf16.mxu1 %v8375_v52 }
 0x2f1   : > { %6741 = vmatmul.mubr.f32.gmra.mrb[6].mxu1 %v1991_v9 }
 0x2f2   : > { %6751 = vmatprep.mubr.msk.f32.mxu1 %vm8376_vm2, %v8374_v0 }
 0x2f5   : > { %6752 = vmatmul.mubr.f32.vlgmr.msra.gmra.mrb[2].mxu1 %v9171_v6 }
 0x2f6   : > { %7532 = vmatpush3.bf16.msra.mxu1 %v7531_v11  ;;  %6754 = vmatprep.mubr.msk.f32.mxu1 %vm8376_vm2, %v8374_v0 }
 0x2f7   : > { %7533 = vmatprep.subr.bf16.mxu1 %v8375_v52 }
 0x2f9   : > { %6755 = vmatmul.mubr.f32.gmra.mrb[4].mxu1 %v9222_v57 }
 0x2fa   : > { %6757 = vmatprep.mubr.msk.f32.mxu1 %vm8376_vm2, %v8374_v0  ;;  %7535 = vmatpush3.bf16.msra.mxu1 %v7534_v23 }
 0x2fb   : > { %7536 = vmatprep.subr.bf16.mxu1 %v8375_v52 }
 0x2fd   : > { %6758 = vmatmul.mubr.f32.gmra.mrb[6].mxu1 %v9240_v50 }
 0x2fe   : > { %6768 = vmatprep.mubr.msk.f32.mxu1 %vm8376_vm2, %v8374_v0 }
 0x301   : > { %6769 = vmatmul.mubr.f32.vlgmr.msra.gmra.mrb[2].mxu1 %v9174_v1  ;;  %v7543_v1 = vpack.c.bf16 %v2007_v47, %v2000_v14 }
 0x302   : > { %7538 = vmatpush3.bf16.msra.mxu1 %v9226_v35  ;;  %6771 = vmatprep.mubr.msk.f32.mxu1 %vm8376_vm2, %v8374_v0 }
 0x303   : > { %7539 = vmatprep.subr.bf16.mxu1 %v8375_v52 }
 0x305   : > { %6772 = vmatmul.mubr.f32.gmra.mrb[4].mxu1 %v9238_v49 }
 0x306   : > { %6774 = vmatprep.mubr.msk.f32.mxu1 %vm8376_vm2, %v8374_v0  ;;  %7541 = vmatpush3.bf16.msra.mxu1 %v9244_v39 }
 0x307   : > { %7542 = vmatprep.subr.bf16.mxu1 %v8375_v52 }
 0x309   : > { %6775 = vmatmul.mubr.f32.gmra.mrb[6].mxu1 %v1988_v2 }
 0x30a   : > { %6785 = vmatprep.mubr.msk.f32.mxu1 %vm8376_vm2, %v8374_v0 }
 0x30d   : > { %6786 = vmatmul.mubr.f32.vlgmr.msra.gmra.mrb[2].mxu1 %v9177_v8 }
 0x30e   : > { %7544 = vmatpush3.bf16.msra.mxu1 %v7543_v1  ;;  %6788 = vmatprep.mubr.msk.f32.mxu1 %vm8376_vm2, %v8374_v0 }
 0x30f   : > { %7545 = vmatprep.subr.bf16.mxu1 %v8375_v52 }
 0x311   : > { %6789 = vmatmul.mubr.f32.gmra.mrb[4].mxu1 %v1979_v3 }
 0x312   : > { %6791 = vmatprep.mubr.msk.f32.mxu1 %vm8376_vm2, %v8374_v0  ;;  %7547 = vmatpush3.bf16.msra.mxu1 %v7546_v21 }
 0x313   : > { %7548 = vmatprep.subr.bf16.mxu1 %v8375_v52 }
 0x315   : > { %6792 = vmatmul.mubr.f32.gmra.mrb[6].mxu1 %v1989_v36 }
 0x316   : > { %6802 = vmatprep.mubr.msk.f32.mxu1 %vm8376_vm2, %v8374_v0 }
 0x319   : > { %6803 = vmatmul.mubr.f32.vlgmr.msra.gmra.mrb[2].mxu1 %v9171_v6 }
 0x31a   : > { %7550 = vmatpush3.bf16.msra.mxu1 %v9226_v35  ;;  %6805 = vmatprep.mubr.msk.f32.mxu1 %vm8376_vm2, %v8374_v0 }
 0x31b   : > { %7551 = vmatprep.subr.bf16.mxu1 %v8375_v52 }
 0x31d   : > { %6806 = vmatmul.mubr.f32.gmra.mrb[4].mxu1 %v9222_v57 }
 0x31e   : > { %6808 = vmatprep.mubr.msk.f32.mxu1 %vm8376_vm2, %v8374_v0  ;;  %7553 = vmatpush3.bf16.msra.mxu1 %v9244_v39 }
 0x31f   : > { %7554 = vmatprep.subr.bf16.mxu1 %v8375_v52 }
 0x321   : > { %6809 = vmatmul.mubr.f32.gmra.mrb[6].mxu1 %v9240_v50 }
 0x322   : > { %6819 = vmatprep.mubr.msk.f32.mxu1 %vm8376_vm2, %v8374_v0 }
 0x325   : > { %6820 = vmatmul.mubr.f32.vlgmr.msra.gmra.mrb[2].mxu1 %v9171_v6 }
 0x326   : > { %6822 = vmatprep.mubr.msk.f32.mxu1 %vm8376_vm2, %v8374_v0 }
 0x329   : > { %6823 = vmatmul.mubr.f32.gmra.mrb[4].mxu1 %v9222_v57 }
 0x32a   : > { %6825 = vmatprep.mubr.msk.f32.mxu1 %vm8376_vm2, %v8374_v0 }
 0x32d   : > { %6826 = vmatmul.mubr.f32.gmra.mrb[6].mxu1 %v9240_v50 }
 0x32e   : > { %6834 = vmatprep.mubr.msk.f32.mxu1 %vm8376_vm2, %v8374_v0 }
 0x3b4   : > { %v1877_v8 = vpop.f32.mrb[0].mxu1 }
 0x3b5   : > { %v6725_v12 = vpop.f32.mrb[1].mxu1  ;;  %v9332_v25 = vadd.f32 %v6320_v17, %v1877_v8 }
 0x3b7   : > { %v2471_v37 = vsel %vm2469_vm3, %v9332_v25, 0 }
 0x3b8   : > { %v9340_v45 = vand.u32 4294901760, %v2471_v37 }
 0x3ba   : > { %v2551_v31 = vsub.f32 %v2471_v37, %v9340_v45 }
 0x3bc   : > { %v2552_v14 = vand.u32 4294901760, %v2551_v31 }
 0x3be   : > { %v2553_v48 = vsub.f32 %v2551_v31, %v2552_v14 }
 0x3c0   : > { %v2554_v28 = vand.u32 4294901760, %v2553_v48 }
 0x3f8   : > { %v2453_v6 = vpop.f32.mrb[2].mxu1 }
 0x3f9   : > { %v9334_v29 = vadd.f32 %v6321_v27, %v2453_v6  ;;  %v6821_v40 = vpop.f32.mrb[3].mxu1 }
 0x3fb   : > { %v2474_v43 = vsel %vm2469_vm3, %v9334_v29, 0 }
 0x3fc   : > { %v2483_v30 = vand.u32 4294901760, %v2474_v43  ;;  %v2459_v44 = vpop.f32.mrb[4].mxu1 }
 0x3fd   : > { %v9342_v53 = vadd.f32 %v6321_v27, %v2459_v44  ;;  %v6824_v55 = vpop.f32.mrb[5].mxu1 }
 0x3fe   : > { %v2562_v58 = vsub.f32 %v2474_v43, %v2483_v30 }
 0x3ff   : > { %v2477_v15 = vsel %vm2469_vm3, %v9342_v53, 0 }
 0x400   : > { %v2486_v20 = vand.u32 4294901760, %v2477_v15  ;;  %v2465_v22 = vpop.f32.mrb[6].mxu1  ;;  %v2563_v42 = vand.u32 4294901760, %v2562_v58 }
 0x401   : > { %v9347_v33 = vadd.f32 %v6321_v27, %v2465_v22  ;;  %v6827_v56 = vpop.f32.mrb[7].mxu1 }
 0x402   : > { %v2569_v19 = vsub.f32 %v2477_v15, %v2486_v20  ;;  %v7555_v59 = vpack.c.bf16 %v2486_v20, %v2483_v30  ;;  %v2564_v7 = vsub.f32 %v2562_v58, %v2563_v42 }
 0x403   : > { %v2480_v38 = vsel %vm2469_vm3, %v9347_v33, 0 }
 0x404   : > { %7556 = vmatpush3.bf16.xpose.msra.mxu1 %v7555_v59  ;;  %v2489_v46 = vand.u32 4294901760, %v2480_v38  ;;  %v2570_v13 = vand.u32 4294901760, %v2569_v19  ;;  %v2565_v34 = vand.u32 4294901760, %v2564_v7  ;;  %v7561_v39 = vpack.c.bf16 %v2569_v19, %v2562_v58 }
 0x405   : > { %6832 = vmatprep.subr.mxu1 %v8374_v0 }
 0x406   : > { %v2576_v47 = vsub.f32 %v2480_v38, %v2489_v46  ;;  %v2571_v57 = vsub.f32 %v2569_v19, %v2570_v13  ;;  %v7567_v60 = vpack.c.bf16 %v2570_v13, %v2563_v42 }
 0x408   : > { %v2572_v35 = vand.u32 4294901760, %v2571_v57  ;;  %v2577_v18 = vand.u32 4294901760, %v2576_v47 }
 0x40a   : > { %v7558_v10 = vpack.c.bf16 %v2572_v35, %v2565_v34  ;;  %v2578_v49 = vsub.f32 %v2576_v47, %v2577_v18 }
 0x40c   : > { %6833 = vmatpush3.xpose.msra.mxu1 %v2489_v46  ;;  %7559 = vmatpush3.bf16.xpose.msra.mxu0 %v7558_v10  ;;  %v2579_v50 = vand.u32 4294901760, %v2578_v49 }
 0x40d   : > { %6841 = vmatprep.subr.mxu0 %v8374_v0  ;;  %7572 = vmatprep.subr.bf16.mxu1 %v8375_v52 }
 0x40f   : > { %6835 = vmatmul.mubr.f32.vlgmr.msra.gmra.mrb[8].mxu1 %v2554_v28 }
 0x410   : > { %6888 = vmatprep.mubr.msk.f32.mxu1 %vm8376_vm2, %v8374_v0 }
 0x414   : > { %6842 = vmatpush3.xpose.msra.mxu0 %v2579_v50 }
 0x415   : > { %7560 = vmatprep.subr.bf16.mxu0 %v8375_v52 }
 0x417   : > { %6844 = vmatmul.mubr.f32.vlgmr.msra.gmra.mrb[2].mxu0 %v9340_v45 }
 0x418   : > { %7562 = vmatpush3.bf16.xpose.msra.mxu0 %v7561_v39  ;;  %6852 = vmatprep.mubr.msk.f32.mxu0 %vm8376_vm2, %v8374_v0 }
 0x419   : > { %6850 = vmatprep.subr.mxu0 %v8374_v0 }
 0x420   : > { %6851 = vmatpush3.xpose.msra.mxu0 %v2576_v47 }
 0x421   : > { %7563 = vmatprep.subr.bf16.mxu0 %v8375_v52 }
 0x423   : > { %6853 = vmatmul.mubr.f32.vlgmr.msra.gmra.mrb[2].mxu0 %v2551_v31 }
 0x424   : > { %7565 = vmatpush3.bf16.xpose.msra.mxu0 %v7555_v59  ;;  %6861 = vmatprep.mubr.msk.f32.mxu0 %vm8376_vm2, %v8374_v0 }
 0x425   : > { %6859 = vmatprep.subr.mxu0 %v8374_v0 }
 0x42c   : > { %6860 = vmatpush3.xpose.msra.mxu0 %v2489_v46 }
 0x42d   : > { %7566 = vmatprep.subr.bf16.mxu0 %v8375_v52 }
 0x42f   : > { %6862 = vmatmul.mubr.f32.vlgmr.msra.gmra.mrb[2].mxu0 %v2552_v14 }
 0x430   : > { %7568 = vmatpush3.bf16.xpose.msra.mxu0 %v7567_v60  ;;  %6870 = vmatprep.mubr.msk.f32.mxu0 %vm8376_vm2, %v8374_v0 }
 0x431   : > { %6868 = vmatprep.subr.mxu0 %v8374_v0 }
 0x438   : > { %6869 = vmatpush3.xpose.msra.mxu0 %v2577_v18 }
 0x439   : > { %7569 = vmatprep.subr.bf16.mxu0 %v8375_v52 }
 0x43b   : > { %6871 = vmatmul.mubr.f32.vlgmr.msra.gmra.mrb[2].mxu0 %v9340_v45 }
 0x43c   : > { %7571 = vmatpush3.bf16.xpose.msra.mxu0 %v7555_v59  ;;  %6879 = vmatprep.mubr.msk.f32.mxu0 %vm8376_vm2, %v8374_v0 }
 0x43d   : > { %6877 = vmatprep.subr.mxu0 %v8374_v0 }
 0x444   : > { %6878 = vmatpush3.xpose.msra.mxu0 %v2489_v46 }
 0x445   : > { %7608 = vmatprep.subr.bf16.mxu0 %v8375_v52 }
 0x447   : > { %6880 = vmatmul.mubr.f32.vlgmr.msra.gmra.mrb[2].mxu0 %v9340_v45 }
 0x448   : > { %6996 = vmatprep.mubr.msk.f32.mxu0 %vm8376_vm2, %v8374_v0 }
 0x4e2   : > { %v2556_v61 = vpop.f32.mrb[8].mxu1 }
 0x4e3   : > { %v6836_v62 = vpop.f32.mrb[9].mxu1 }
 0x51a   : > { %v2950_v63 = vpop.f32.mrb[2].mxu0 }
 0x51b   : > { %v7848_v2 = vadd.f32 %v2950_v63, %v2556_v61  ;;  %v6881_v3 = vpop.f32.mrb[3].mxu0 }
 0x51d   : > { %v2954_v16 = vmul.f32 0.25, %v7848_v2 }
 0x51f   : > { %v2956_v4 = vsel %vm2955_vm4, %v2954_v16, -inf }
 0x520   : > { %2957 = vmax.xlane.f32.xlu1 %v2956_v4 }
 0x531   : > { %2969 = vrot.lane.b32.xlu1 %v9342_v53, %s8378_s25 }
 0x535   : > { %2971 = vrot.lane.b32.xlu1 %v9347_v33, %s8378_s25 }
 0x539   : > { %3455 = vrot.lane.b32.xlu1 %v9342_v53, %s8380_s30 }
 0x53d   : > { %3457 = vrot.lane.b32.xlu1 %v9347_v33, %s8380_s30 }
 0x5ad   : > { %v2958_v24 = vpop.xlane.xlu1 %2957 }
 0x5ae   : > { %v2959_v5 = vsub.f32 %v2954_v16, %v2958_v24 }
 0x5b0   : > { %v2960_v36 = vmul.f32 1.442695, %v2959_v5 }
 0x5b1   : > { %v2970_v9 = vpop.permute.xlu1 %2969 }
 0x5b2   : > { %8076 = vpow2.f32 %v2960_v36  ;;  %v2983_v23 = vand.u32 4294901760, %v2970_v9 }
 0x5b4   : > { %v3066_v17 = vsub.f32 %v2970_v9, %v2983_v23 }
 0x5b5   : > { %v2972_v8 = vpop.permute.xlu1 %2971 }
 0x5b6   : > { %v2986_v6 = vand.u32 4294901760, %v2972_v8  ;;  %v3067_v43 = vand.u32 4294901760, %v3066_v17 }
 0x5b8   : > { %v3073_v44 = vsub.f32 %v2972_v8, %v2986_v6  ;;  %v3068_v58 = vsub.f32 %v3066_v17, %v3067_v43 }
 0x5b9   : > { %v3456_v14 = vpop.permute.xlu1 %3455 }
 0x5ba   : > { %v3074_v20 = vand.u32 4294901760, %v3073_v44  ;;  %v3069_v31 = vand.u32 4294901760, %v3068_v58  ;;  %v3463_v34 = vsel %vm2469_vm3, %v3456_v14, 0 }
 0x5bb   : > { %v3471_v10 = vand.u32 4294901760, %v3463_v34 }
 0x5bc   : > { %v8077_v41 = vpop.eup %8076  ;;  %v3075_v19 = vsub.f32 %v3073_v44, %v3074_v20 }
 0x5bd   : > { %v2962_v51 = vsel %vm2955_vm4, %v8077_v41, 0.0  ;;  %v3554_v49 = vsub.f32 %v3463_v34, %v3471_v10  ;;  %v3458_v50 = vpop.permute.xlu1 %3457 }
 0x5be   : > { %2963 = vadd.xlane.f32.xlu0 %v2962_v51  ;;  %v3076_v38 = vand.u32 4294901760, %v3075_v19  ;;  %v3465_v62 = vsel %vm2469_vm3, %v3458_v50, 0 }
 0x5bf   : > { %v3555_v63 = vand.u32 4294901760, %v3554_v49  ;;  %v3474_v3 = vand.u32 4294901760, %v3465_v62 }
 0x5c1   : > { %v3556_v4 = vsub.f32 %v3554_v49, %v3555_v63  ;;  %v3561_v5 = vsub.f32 %v3465_v62, %v3474_v3  ;;  %v4441_v62 = vld [vmem:[%s9937_s14 + $0x8] sm:$0xff] }
 0x5d4   : > { %2967 = vrot.lane.b32.xlu0 %v9334_v29, %s8378_s25 }
 0x5d8   : > { %3453 = vrot.lane.b32.xlu0 %v9334_v29, %s8380_s30 }
 0x5dc   : > { %3451 = vrot.lane.b32.xlu0 %v9332_v25, %s8380_s30 }
 0x64b   : > { %v2964_v54 = vpop.xlane.xlu0 %2963 }
 0x64c   : > { %8078 = vrcp.f32 %v2964_v54  ;;  %v3562_v54 = vand.u32 4294901760, %v3561_v5 }
 0x64f   : > { %v2968_v11 = vpop.permute.xlu0 %2967 }
 0x650   : > { %v2980_v1 = vand.u32 4294901760, %v2968_v11 }
 0x652   : > { %v7573_v21 = vpack.c.bf16 %v2983_v23, %v2980_v1  ;;  %v3059_v12 = vsub.f32 %v2968_v11, %v2980_v1  ;;  %v3563_v11 = vsub.f32 %v3561_v5, %v3562_v54 }
 0x653   : > { %v3454_v13 = vpop.permute.xlu0 %3453 }
 0x654   : > { %7574 = vmatpush3.bf16.msra.mxu1 %v7573_v21  ;;  %v3060_v37 = vand.u32 4294901760, %v3059_v12  ;;  %v7579_v46 = vpack.c.bf16 %v3066_v17, %v3059_v12  ;;  %v3461_v47 = vsel %vm2469_vm3, %v3454_v13, 0  ;;  %v3564_v23 = vand.u32 4294901760, %v3563_v11 }
 0x655   : > { %6886 = vmatprep.subr.mxu1 %v8374_v0  ;;  %v3468_v35 = vand.u32 4294901760, %v3461_v47 }
 0x656   : > { %v8079_v27 = vpop.eup %8078  ;;  %v3061_v45 = vsub.f32 %v3059_v12, %v3060_v37  ;;  %v7585_v7 = vpack.c.bf16 %v3067_v43, %v3060_v37 }
 0x657   : > { %v2966_v40 = vmul.f32 %v8079_v27, %v8077_v41  ;;  %v3452_v57 = vpop.permute.xlu0 %3451  ;;  %v3547_v28 = vsub.f32 %v3461_v47, %v3468_v35  ;;  %v7591_v60 = vpack.c.bf16 %v3471_v10, %v3468_v35  ;;  %v3557_v41 = vand.u32 4294901760, %v3556_v4 }
 0x658   : > { %6887 = vmatpush3.msra.mxu1 %v2986_v6  ;;  %v3062_v22 = vand.u32 4294901760, %v3061_v45  ;;  %v3459_v48 = vsel %vm2469_vm3, %v3452_v57, 0 }
 0x659   : > { %7575 = vmatprep.subr.bf16.mxu1 %v8375_v52  ;;  %v2977_v25 = vsel %vm2955_vm4, %v2966_v40, 0  ;;  %v3535_v18 = vand.u32 4294901760, %v3459_v48  ;;  %v3548_v61 = vand.u32 4294901760, %v3547_v28  ;;  %v7597_v1 = vpack.c.bf16 %v3554_v49, %v3547_v28 }
 0x65a   : > { %v3047_v30 = vand.u32 4294901760, %v2977_v25  ;;  %v7576_v59 = vpack.c.bf16 %v3069_v31, %v3062_v22 }
 0x65b   : > { %v3536_v39 = vsub.f32 %v3459_v48, %v3535_v18  ;;  %v3549_v16 = vsub.f32 %v3547_v28, %v3548_v61 }
 0x65c   : > { %v3048_v55 = vsub.f32 %v2977_v25, %v3047_v30 }
 0x65d   : > { %v3537_v2 = vand.u32 4294901760, %v3536_v39  ;;  %v3550_v36 = vand.u32 4294901760, %v3549_v16 }
 0x65e   : > { %v3049_v15 = vand.u32 4294901760, %v3048_v55 }
 0x65f   : > { %v3538_v24 = vsub.f32 %v3536_v39, %v3537_v2  ;;  %v7594_v9 = vpack.c.bf16 %v3557_v41, %v3550_v36  ;;  %v4442_v36 = vld [vmem:[%s9937_s14 + $0x10] sm:$0xff]  ;;  %v4443_v41 = vld [vmem:[%s9937_s14 + $0x18] sm:$0xff] }
 0x660   : > { %v3050_v42 = vsub.f32 %v3048_v55, %v3049_v15 }
 0x661   : > { %v3539_v51 = vand.u32 4294901760, %v3538_v24 }
 0x662   : > { %v3051_v56 = vand.u32 4294901760, %v3050_v42 }
 0x664   : > { %6889 = vmatmul.mubr.f32.vlgmr.msra.gmra.mrb[10].mxu1 %v3051_v56 }
 0x665   : > { %7577 = vmatpush3.bf16.msra.mxu1 %v7576_v59  ;;  %6897 = vmatprep.mubr.msk.f32.mxu1 %vm8376_vm2, %v8374_v0 }
 0x666   : > { %6895 = vmatprep.subr.mxu1 %v8374_v0 }
 0x669   : > { %6896 = vmatpush3.msra.mxu1 %v3076_v38 }
 0x66a   : > { %7578 = vmatprep.subr.bf16.mxu1 %v8375_v52 }
 0x66c   : > { %6898 = vmatmul.mubr.f32.vlgmr.msra.gmra.mrb[10].mxu1 %v3047_v30 }
 0x66d   : > { %7580 = vmatpush3.bf16.msra.mxu1 %v7579_v46  ;;  %6906 = vmatprep.mubr.msk.f32.mxu1 %vm8376_vm2, %v8374_v0 }
 0x66e   : > { %6904 = vmatprep.subr.mxu1 %v8374_v0 }
 0x671   : > { %6905 = vmatpush3.msra.mxu1 %v3073_v44 }
 0x672   : > { %7581 = vmatprep.subr.bf16.mxu1 %v8375_v52 }
 0x674   : > { %6907 = vmatmul.mubr.f32.vlgmr.msra.gmra.mrb[10].mxu1 %v3048_v55 }
 0x675   : > { %7583 = vmatpush3.bf16.msra.mxu1 %v7573_v21  ;;  %6915 = vmatprep.mubr.msk.f32.mxu1 %vm8376_vm2, %v8374_v0 }
 0x676   : > { %6913 = vmatprep.subr.mxu1 %v8374_v0 }
 0x679   : > { %6914 = vmatpush3.msra.mxu1 %v2986_v6 }
 0x67a   : > { %7584 = vmatprep.subr.bf16.mxu1 %v8375_v52 }
 0x67c   : > { %6916 = vmatmul.mubr.f32.vlgmr.msra.gmra.mrb[10].mxu1 %v3049_v15 }
 0x67d   : > { %7586 = vmatpush3.bf16.msra.mxu1 %v7585_v7  ;;  %6924 = vmatprep.mubr.msk.f32.mxu1 %vm8376_vm2, %v8374_v0 }
 0x67e   : > { %6922 = vmatprep.subr.mxu1 %v8374_v0 }
 0x681   : > { %6923 = vmatpush3.msra.mxu1 %v3074_v20 }
 0x682   : > { %7587 = vmatprep.subr.bf16.mxu1 %v8375_v52 }
 0x684   : > { %6925 = vmatmul.mubr.f32.vlgmr.msra.gmra.mrb[10].mxu1 %v3047_v30 }
 0x685   : > { %7589 = vmatpush3.bf16.msra.mxu1 %v7573_v21  ;;  %6933 = vmatprep.mubr.msk.f32.mxu1 %vm8376_vm2, %v8374_v0  ;;  %v7603_v21 = vpack.c.bf16 %v3555_v63, %v3548_v61  ;;  %v4440_v61 = vld [vmem:[%s9937_s14] sm:$0xff] }
 0x686   : > { %6931 = vmatprep.subr.mxu1 %v8374_v0  ;;  %v4455_v63 = vand.u32 4294901760, %v4440_v61 }
 0x689   : > { %6932 = vmatpush3.msra.mxu1 %v2986_v6 }
 0x68a   : > { %7590 = vmatprep.subr.bf16.mxu1 %v8375_v52 }
 0x68c   : > { %6934 = vmatmul.mubr.f32.vlgmr.msra.gmra.mrb[10].mxu1 %v3047_v30 }
 0x68d   : > { %6942 = vmatprep.mubr.msk.f32.mxu1 %vm8376_vm2, %v8374_v0 }
 0x690   : > { %7592 = vmatpush3.bf16.xpose.msra.mxu1 %v7591_v60 }
 0x691   : > { %6940 = vmatprep.subr.mxu1 %v8374_v0 }
 0x698   : > { %6941 = vmatpush3.xpose.msra.mxu1 %v3474_v3 }
 0x699   : > { %7593 = vmatprep.subr.bf16.mxu1 %v8375_v52 }
 0x69b   : > { %6943 = vmatmul.mubr.f32.vlgmr.msra.gmra.mrb[12].mxu1 %v3539_v51  ;;  %v4461_v51 = vand.u32 4294901760, %v4442_v36 }
 0x69c   : > { %7595 = vmatpush3.bf16.xpose.msra.mxu1 %v7594_v9  ;;  %6951 = vmatprep.mubr.msk.f32.mxu1 %vm8376_vm2, %v8374_v0 }
 0x69d   : > { %6949 = vmatprep.subr.mxu1 %v8374_v0  ;;  %v4549_v9 = vsub.f32 %v4442_v36, %v4461_v51 }
 0x6a4   : > { %6950 = vmatpush3.xpose.msra.mxu1 %v3564_v23  ;;  %v4550_v23 = vand.u32 4294901760, %v4549_v9 }
 0x6a5   : > { %7596 = vmatprep.subr.bf16.mxu1 %v8375_v52 }
 0x6a7   : > { %6952 = vmatmul.mubr.f32.vlgmr.msra.gmra.mrb[12].mxu1 %v3535_v18 }
 0x6a8   : > { %7598 = vmatpush3.bf16.xpose.msra.mxu1 %v7597_v1  ;;  %6960 = vmatprep.mubr.msk.f32.mxu1 %vm8376_vm2, %v8374_v0 }
 0x6a9   : > { %6958 = vmatprep.subr.mxu1 %v8374_v0 }
 0x6b0   : > { %6959 = vmatpush3.xpose.msra.mxu1 %v3561_v5 }
 0x6b1   : > { %7599 = vmatprep.subr.bf16.mxu1 %v8375_v52 }
 0x6b3   : > { %6961 = vmatmul.mubr.f32.vlgmr.msra.gmra.mrb[12].mxu1 %v3536_v39 }
 0x6b4   : > { %7601 = vmatpush3.bf16.xpose.msra.mxu1 %v7591_v60  ;;  %6969 = vmatprep.mubr.msk.f32.mxu1 %vm8376_vm2, %v8374_v0 }
 0x6b5   : > { %6967 = vmatprep.subr.mxu1 %v8374_v0 }
 0x6bc   : > { %6968 = vmatpush3.xpose.msra.mxu1 %v3474_v3 }
 0x6bd   : > { %7602 = vmatprep.subr.bf16.mxu1 %v8375_v52 }
 0x6bf   : > { %6970 = vmatmul.mubr.f32.vlgmr.msra.gmra.mrb[12].mxu1 %v3537_v2  ;;  %v4458_v2 = vand.u32 4294901760, %v4441_v62 }
 0x6c0   : > { %7604 = vmatpush3.bf16.xpose.msra.mxu1 %v7603_v21  ;;  %6978 = vmatprep.mubr.msk.f32.mxu1 %vm8376_vm2, %v8374_v0 }
 0x6c1   : > { %6976 = vmatprep.subr.mxu1 %v8374_v0  ;;  %v4542_v16 = vsub.f32 %v4441_v62, %v4458_v2  ;;  %v8086_v62 = vld [vmem:[%s8743_s15] sm:$0xff] }
 0x6c3   : > { %v4543_v24 = vand.u32 4294901760, %v4542_v16 }
 0x6c8   : > { %6977 = vmatpush3.xpose.msra.mxu1 %v3562_v54  ;;  %v4464_v54 = vand.u32 4294901760, %v4443_v41 }
 0x6c9   : > { %7605 = vmatprep.subr.bf16.mxu1 %v8375_v52 }
 0x6ca   : > { %v4556_v11 = vsub.f32 %v4443_v41, %v4464_v54 }
 0x6cb   : > { %6979 = vmatmul.mubr.f32.vlgmr.msra.gmra.mrb[12].mxu1 %v3535_v18 }
 0x6cc   : > { %7607 = vmatpush3.bf16.xpose.msra.mxu1 %v7591_v60  ;;  %6987 = vmatprep.mubr.msk.f32.mxu1 %vm8376_vm2, %v8374_v0  ;;  %v4557_v1 = vand.u32 4294901760, %v4556_v11 }
 0x6cd   : > { %6985 = vmatprep.subr.mxu1 %v8374_v0 }
 0x6ce   : > { %v7654_v21 = vpack.c.bf16 %v4557_v1, %v4550_v23 }
 0x6d4   : > { %6986 = vmatpush3.xpose.msra.mxu1 %v3474_v3  ;;  %v4535_v3 = vsub.f32 %v4440_v61, %v4455_v63 }
 0x6d5   : > { %7650 = vmatprep.subr.bf16.mxu1 %v8375_v52 }
 0x6d6   : > { %v4536_v4 = vand.u32 4294901760, %v4535_v3 }
 0x6d7   : > { %6988 = vmatmul.mubr.f32.vlgmr.msra.gmra.mrb[12].mxu1 %v3535_v18 }
 0x6d8   : > { %7096 = vmatprep.mubr.msk.f32.mxu1 %vm8376_vm2, %v8374_v0  ;;  %v7651_v5 = vpack.c.bf16 %v4543_v24, %v4536_v4 }
 0x6da   : > { %7652 = vmatpush3.bf16.msra.mxu1 %v7651_v5 }
 0x6db   : > { %7653 = vmatprep.subr.bf16.mxu1 %v8375_v52 }
 0x6de   : > { %7655 = vmatpush3.bf16.msra.mxu1 %v7654_v21 }
 0x6df   : > { %7662 = vmatprep.subr.bf16.mxu1 %v8375_v52 }
 0x75f   : > { %v9443_v8 = vpop.f32.mrb[10].mxu1 }
 0x760   : > { %v6935_v12 = vpop.f32.mrb[11].mxu1 }
 0x761   : > { %v7627_v12 = vpack.c.bf16 %v4458_v2, %v4455_v63 }
 0x7aa   : > { %v3935_v17 = vpop.f32.mrb[12].mxu1 }
 0x7ab   : > { %v3939_v27 = vmul.f32 0.25, %v3935_v17  ;;  %v6989_v6 = vpop.f32.mrb[13].mxu1  ;;  %v7630_v17 = vpack.c.bf16 %v4464_v54, %v4461_v51  ;;  %v4968_v51 = vld [vmem:[#allocation13] sm:$0xff]  ;;  %v4969_v54 = vld [vmem:[#allocation13 + $0x8] sm:$0xff] }
 0x7ac   : > { %v4558_v6 = vsub.f32 %v4556_v11, %v4557_v1  ;;  %v4971_v1 = vld [vmem:[#allocation13 + $0x18] sm:$0xff] }
 0x7ad   : > { %v3940_v40 = vsel %vm2955_vm4, %v3939_v27, -inf }
 0x7ae   : > { %3941 = vmax.xlane.f32.xlu0 %v3940_v40 }
 0x7c4   : > { %3951 = vrot.lane.b32.xlu0 %v9334_v29, %s8381_s10 }
 0x7c8   : > { %3955 = vrot.lane.b32.xlu0 %v9347_v33, %s8381_s10 }
 0x83b   : > { %v3942_v37 = vpop.xlane.xlu0 %3941 }
 0x83c   : > { %v3943_v43 = vsub.f32 %v3939_v27, %v3942_v37  ;;  %v4551_v27 = vsub.f32 %v4549_v9, %v4550_v23  ;;  %v4986_v23 = vand.u32 4294901760, %v4969_v54 }
 0x83e   : > { %v3944_v25 = vmul.f32 1.442695, %v3943_v43  ;;  %v4552_v43 = vand.u32 4294901760, %v4551_v27 }
 0x83f   : > { %v3952_v55 = vpop.permute.xlu0 %3951 }
 0x840   : > { %8080 = vpow2.f32 %v3944_v25  ;;  %v3964_v15 = vand.u32 4294901760, %v3952_v55  ;;  %v4559_v25 = vand.u32 4294901760, %v4558_v6  ;;  %v9535_v6 = vsub.f32 %v4969_v54, %v4986_v23 }
 0x842   : > { %v4043_v33 = vsub.f32 %v3952_v55, %v3964_v15 }
 0x843   : > { %v3956_v29 = vpop.permute.xlu0 %3955 }
 0x844   : > { %v3970_v56 = vand.u32 4294901760, %v3956_v29  ;;  %v4044_v38 = vand.u32 4294901760, %v4043_v33 }
 0x846   : > { %v4057_v7 = vsub.f32 %v3956_v29, %v3970_v56  ;;  %v4045_v47 = vsub.f32 %v4043_v33, %v4044_v38 }
 0x848   : > { %v4058_v34 = vand.u32 4294901760, %v4057_v7  ;;  %v4046_v10 = vand.u32 4294901760, %v4045_v47 }
 0x84a   : > { %v8081_v30 = vpop.eup %8080  ;;  %v4059_v28 = vsub.f32 %v4057_v7, %v4058_v34 }
 0x84b   : > { %v3946_v44 = vsel %vm2955_vm4, %v8081_v30, 0.0 }
 0x84c   : > { %3947 = vadd.xlane.f32.xlu1 %v3946_v44  ;;  %v4060_v50 = vand.u32 4294901760, %v4059_v28  ;;  %v7642_v44 = vpack.c.bf16 %v4556_v11, %v4549_v9  ;;  %v4970_v9 = vld [vmem:[#allocation13 + $0x10] sm:$0xff]  ;;  %v4983_v11 = vand.u32 4294901760, %v4968_v51 }
 0x84d   : > { %v4989_v21 = vand.u32 4294901760, %v4970_v9 }
 0x84e   : > { %v9533_v27 = vsub.f32 %v4968_v51, %v4983_v11 }
 0x85d   : > { %3953 = vrot.lane.b32.xlu1 %v9342_v53, %s8381_s10  ;;  %s8382_s10 = smov 16  }
 0x8d9   : > { %v3948_v45 = vpop.xlane.xlu1 %3947 }
 0x8da   : > { %8082 = vrcp.f32 %v3948_v45 }
 0x8dd   : > { %v3954_v58 = vpop.permute.xlu1 %3953 }
 0x8de   : > { %v3967_v20 = vand.u32 4294901760, %v3954_v58 }
 0x8e0   : > { %v7609_v22 = vpack.c.bf16 %v3967_v20, %v3964_v15  ;;  %v4050_v42 = vsub.f32 %v3954_v58, %v3967_v20  ;;  %v4537_v15 = vsub.f32 %v4535_v3, %v4536_v4  ;;  %v4544_v20 = vsub.f32 %v4542_v16, %v4543_v24 }
 0x8e2   : > { %7610 = vmatpush3.bf16.msra.mxu0 %v7609_v22  ;;  %v4051_v59 = vand.u32 4294901760, %v4050_v42  ;;  %v7615_v39 = vpack.c.bf16 %v4050_v42, %v4043_v33  ;;  %v4545_v33 = vand.u32 4294901760, %v4544_v20 }
 0x8e3   : > { %6994 = vmatprep.subr.mxu0 %v8374_v0 }
 0x8e4   : > { %v8083_v31 = vpop.eup %8082  ;;  %v4052_v13 = vsub.f32 %v4050_v42, %v4051_v59  ;;  %v7621_v60 = vpack.c.bf16 %v4051_v59, %v4044_v38  ;;  %v4538_v42 = vand.u32 4294901760, %v4537_v15 }
 0x8e5   : > { %v3950_v19 = vmul.f32 %v8083_v31, %v8081_v30  ;;  %v7636_v30 = vpack.c.bf16 %v4559_v25, %v4552_v43  ;;  %v5064_v25 = vand.u32 4294901760, %v9533_v27 }
 0x8e6   : > { %6995 = vmatpush3.msra.mxu0 %v3970_v56  ;;  %v4053_v35 = vand.u32 4294901760, %v4052_v13  ;;  %v6322_v13 = vld [vmem:[%s9938_s9] ss:$0 sm:$0xff]  ;;  %s616_s9 = scalar_lea.vmem [#allocation14], %s6309_s17  ;;  %s8383_s17 = smov [#allocation14]  }
 0x8e7   : > { %7611 = vmatprep.subr.bf16.mxu0 %v8375_v52  ;;  %v3961_v53 = vsel %vm2955_vm4, %v3950_v19, 0  ;;  %v7633_v19 = vpack.c.bf16 %v4545_v33, %v4538_v42  ;;  %s6149_s15 = sshll.u32 %s616_s9, 4  ;;  %s9842_s15 = int_to_ptr.vmem [resolvable:$true] %s6149_s15 }
 0x8e8   : > { %v4031_v46 = vand.u32 4294901760, %v3961_v53  ;;  %v7612_v49 = vpack.c.bf16 %v4053_v35, %v4046_v10  ;;  %s8285_s30 = scalar_lea.vmem %s9842_s15, 128 }
 0x8e9   : > { %p8286_p9 = scmp.ne.s32.totalorder %s9842_s15, %s8285_s30 }
 0x8ea   : > { %v4032_v14 = vsub.f32 %v3961_v53, %v4031_v46 }
 0x8eb   : > { %p8287_p1 = pnand %p8286_p9, %p9943_p12 }
 0x8ec   : > { %v4033_v57 = vand.u32 4294901760, %v4032_v14 }
 0x8ed   : > { %p8288_p13 = pneg %p8287_p1 }
 0x8ee   : > { %v4034_v48 = vsub.f32 %v4032_v14, %v4033_v57 }
 0x8f0   : > { %v4035_v18 = vand.u32 4294901760, %v4034_v48 }
 0x8f2   : > { %6997 = vmatmul.mubr.f32.vlgmr.msra.gmra.mrb[4].mxu0 %v4035_v18 }
 0x8f3   : > { %7613 = vmatpush3.bf16.msra.mxu0 %v7612_v49  ;;  %7005 = vmatprep.mubr.msk.f32.mxu0 %vm8376_vm2, %v8374_v0 }
 0x8f4   : > { %7003 = vmatprep.subr.mxu0 %v8374_v0 }
 0x8f7   : > { %7004 = vmatpush3.msra.mxu0 %v4060_v50 }
 0x8f8   : > { %7614 = vmatprep.subr.bf16.mxu0 %v8375_v52 }
 0x8fa   : > { %7006 = vmatmul.mubr.f32.vlgmr.msra.gmra.mrb[4].mxu0 %v4031_v46 }
 0x8fb   : > { %7616 = vmatpush3.bf16.msra.mxu0 %v7615_v39  ;;  %7014 = vmatprep.mubr.msk.f32.mxu0 %vm8376_vm2, %v8374_v0 }
 0x8fc   : > { %7012 = vmatprep.subr.mxu0 %v8374_v0 }
 0x8ff   : > { %7013 = vmatpush3.msra.mxu0 %v4057_v7 }
 0x900   : > { %7617 = vmatprep.subr.bf16.mxu0 %v8375_v52 }
 0x902   : > { %7015 = vmatmul.mubr.f32.vlgmr.msra.gmra.mrb[4].mxu0 %v4032_v14 }
 0x903   : > { %7619 = vmatpush3.bf16.msra.mxu0 %v7609_v22  ;;  %7023 = vmatprep.mubr.msk.f32.mxu0 %vm8376_vm2, %v8374_v0 }
 0x904   : > { %7021 = vmatprep.subr.mxu0 %v8374_v0 }
 0x907   : > { %7022 = vmatpush3.msra.mxu0 %v3970_v56 }
 0x908   : > { %7620 = vmatprep.subr.bf16.mxu0 %v8375_v52 }
 0x90a   : > { %7024 = vmatmul.mubr.f32.vlgmr.msra.gmra.mrb[4].mxu0 %v4033_v57 }
 0x90b   : > { %7622 = vmatpush3.bf16.msra.mxu0 %v7621_v60  ;;  %7032 = vmatprep.mubr.msk.f32.mxu0 %vm8376_vm2, %v8374_v0 }
 0x90c   : > { %7030 = vmatprep.subr.mxu0 %v8374_v0 }
 0x90f   : > { %7031 = vmatpush3.msra.mxu0 %v4058_v34 }
 0x910   : > { %7623 = vmatprep.subr.bf16.mxu0 %v8375_v52 }
 0x912   : > { %7033 = vmatmul.mubr.f32.vlgmr.msra.gmra.mrb[4].mxu0 %v4031_v46 }
 0x913   : > { %7625 = vmatpush3.bf16.msra.mxu0 %v7609_v22  ;;  %7041 = vmatprep.mubr.msk.f32.mxu0 %vm8376_vm2, %v8374_v0 }
 0x914   : > { %7039 = vmatprep.subr.mxu0 %v8374_v0 }
 0x917   : > { %7040 = vmatpush3.msra.mxu0 %v3970_v56 }
 0x918   : > { %7626 = vmatprep.subr.bf16.mxu0 %v8375_v52 }
 0x91a   : > { %7042 = vmatmul.mubr.f32.vlgmr.msra.gmra.mrb[4].mxu0 %v4031_v46 }
 0x91b   : > { %7052 = vmatprep.mubr.msk.f32.mxu0 %vm8376_vm2, %v8374_v0  ;;  %7628 = vmatpush3.bf16.msra.mxu0 %v7627_v12 }
 0x91c   : > { %7629 = vmatprep.subr.bf16.mxu0 %v8375_v52 }
 0x91f   : > { %7631 = vmatpush3.bf16.msra.mxu0 %v7630_v17 }
 0x920   : > { %7632 = vmatprep.subr.bf16.mxu0 %v8375_v52 }
 0x9ed   : > { %v4431_v40 = vpop.f32.mrb[4].mxu0 }
 0x9ee   : > { %4436 = vrot.lane.b32.xlu1 %v4431_v40, %s8382_s10  ;;  %v7043_v37 = vpop.f32.mrb[5].mxu0  ;;  %v9537_v40 = vsub.f32 %v4970_v9, %v4989_v21  ;;  %s8289_s10 = sshll.u32 %s8383_s17, 4  ;;  %s8290_s10 = int_to_ptr.vmem [resolvable:$false] %s8289_s10 }
 0x9ef   : > { %p8292_p0 = scmp.lt.s32.totalorder %s9842_s15, %s8290_s10 }
 0x9f0   : > { %v5078_v15 = vand.u32 4294901760, %v9537_v40 }
 0xa60   : > { %v4437_v45 = vpop.permute.xlu1 %4436 }
 0xa61   : > { %v4439_v55 = vsel %vm2469_vm3, %v9443_v8, %v4437_v45  ;;  %v7639_v8 = vpack.c.bf16 %v4542_v16, %v4535_v3  ;;  %v4953_v3 = vadd.f32 1.0, %v9145_v32 }
 0xa62   : > { %v4452_v58 = vsel %vm1315_vm0, %v4439_v55, 0 }
 0xa63   : > { %v4523_v22 = vand.u32 4294901760, %v4452_v58  ;;  %v4957_v16 = vrot.slane %v4953_v3, %v9132_v26  ;;  %v5475_v3 = vld [vmem:[%s9939_s29 + $0x30] sm:$0xff] }
 0xa65   : > { %v4524_v29 = vsub.f32 %v4452_v58, %v4523_v22  ;;  %7097 = vmatmul.mubr.f32.vlgmr.msra.gmra.mrb[14].mxu1 %v4523_v22 }
 0xa66   : > { %7118 = vmatprep.mubr.msk.f32.mxu1 %vm8376_vm2, %v8374_v0 }
 0xa67   : > { %v4525_v31 = vand.u32 4294901760, %v4524_v29 }
 0xa69   : > { %v4526_v56 = vsub.f32 %v4524_v29, %v4525_v31 }
 0xa6b   : > { %v4527_v59 = vand.u32 4294901760, %v4526_v56 }
 0xa6d   : > { %7053 = vmatmul.mubr.f32.vlgmr.msra.gmra.mrb[6].mxu0 %v4527_v59 }
 0xa6e   : > { %7634 = vmatpush3.bf16.msra.mxu0 %v7633_v19  ;;  %7063 = vmatprep.mubr.msk.f32.mxu0 %vm8376_vm2, %v8374_v0  ;;  %v7675_v19 = vpack.c.bf16 %v9535_v6, %v9533_v27 }
 0xa6f   : > { %7635 = vmatprep.subr.bf16.mxu0 %v8375_v52 }
 0xa72   : > { %7637 = vmatpush3.bf16.msra.mxu0 %v7636_v30  ;;  %v5071_v30 = vand.u32 4294901760, %v9535_v6 }
 0xa73   : > { %7638 = vmatprep.subr.bf16.mxu0 %v8375_v52 }
 0xa74   : > { %v5072_v45 = vsub.f32 %v9535_v6, %v5071_v30 }
 0xa75   : > { %7064 = vmatmul.mubr.f32.vlgmr.msra.gmra.mrb[8].mxu0 %v4523_v22 }
 0xa76   : > { %7640 = vmatpush3.bf16.msra.mxu0 %v7639_v8  ;;  %7074 = vmatprep.mubr.msk.f32.mxu0 %vm8376_vm2, %v8374_v0  ;;  %v5073_v58 = vand.u32 4294901760, %v5072_v45  ;;  %v9559_v8 = vpack.c.bf16 %v5071_v30, %v5064_v25 }
 0xa77   : > { %7641 = vmatprep.subr.bf16.mxu0 %v8375_v52 }
 0xa7a   : > { %7643 = vmatpush3.bf16.msra.mxu0 %v7642_v44  ;;  %v5065_v44 = vsub.f32 %v9533_v27, %v5064_v25  ;;  %v4966_v27 = vrot.slane %v9145_v32, %v9132_v26 }
 0xa7b   : > { %7644 = vmatprep.subr.bf16.mxu0 %v8375_v52 }
 0xa7c   : > { %v5066_v55 = vand.u32 4294901760, %v5065_v44 }
 0xa7d   : > { %7075 = vmatmul.mubr.f32.vlgmr.msra.gmra.mrb[10].mxu0 %v4524_v29  ;;  %v5079_v29 = vsub.f32 %v9537_v40, %v5078_v15 }
 0xa7e   : > { %7646 = vmatpush3.bf16.msra.mxu0 %v7627_v12  ;;  %7085 = vmatprep.mubr.msk.f32.mxu0 %vm8376_vm2, %v8374_v0 }
 0xa7f   : > { %7647 = vmatprep.subr.bf16.mxu0 %v8375_v52  ;;  %v5080_v33 = vand.u32 4294901760, %v5079_v29 }
 0xa82   : > { %7649 = vmatpush3.bf16.msra.mxu0 %v7630_v17 }
 0xa83   : > { %7656 = vmatprep.subr.bf16.mxu0 %v8375_v52 }
 0xa85   : > { %7086 = vmatmul.mubr.f32.vlgmr.msra.gmra.mrb[12].mxu0 %v4525_v31 }
 0xa86   : > { %7658 = vmatpush3.bf16.msra.mxu0 %v7627_v12  ;;  %7107 = vmatprep.mubr.msk.f32.mxu0 %vm8376_vm2, %v8374_v0  ;;  %v4992_v12 = vand.u32 4294901760, %v4971_v1 }
 0xa87   : > { %7659 = vmatprep.subr.bf16.mxu0 %v8375_v52 }
 0xa88   : > { %v9539_v37 = vsub.f32 %v4971_v1, %v4992_v12  ;;  %v9542_v43 = vpack.c.bf16 %v4992_v12, %v4989_v21 }
 0xa8a   : > { %7661 = vmatpush3.bf16.msra.mxu0 %v7630_v17  ;;  %v9531_v17 = vpack.c.bf16 %v4986_v23, %v4983_v11  ;;  %v5085_v20 = vand.u32 4294901760, %v9539_v37  ;;  %v7678_v59 = vpack.c.bf16 %v9539_v37, %v9537_v40 }
 0xa8b   : > { %7698 = vmatprep.subr.bf16.mxu0 %v8375_v52 }
 0xa8c   : > { %7664 = vmatpush3.bf16.msra.mxu1 %v9531_v17  ;;  %v5086_v42 = vsub.f32 %v9539_v37, %v5085_v20 }
 0xa8d   : > { %7108 = vmatmul.mubr.f32.vlgmr.msra.gmra.mrb[14].mxu0 %v4523_v22  ;;  %7665 = vmatprep.subr.bf16.mxu1 %v8375_v52  ;;  %v7669_v22 = vpack.c.bf16 %v5073_v58, %v5066_v55 }
 0xa8e   : > { %7208 = vmatprep.mubr.msk.f32.mxu0 %vm8376_vm2, %v8374_v0  ;;  %v5087_v31 = vand.u32 4294901760, %v5086_v42 }
 0xa90   : > { %7667 = vmatpush3.bf16.msra.mxu1 %v9542_v43  ;;  %v7672_v56 = vpack.c.bf16 %v5087_v31, %v5080_v33 }
 0xa91   : > { %7668 = vmatprep.subr.bf16.mxu1 %v8375_v52 }
 0xb38   : > { %v4860_v38 = vpop.f32.mrb[14].mxu1 }
 0xb39   : > { %v7098_v53 = vpop.f32.mrb[15].mxu1 }
 0xb3a   : > { %v5469_v53 = vld [vmem:[%s9939_s29] sm:$0xff] }
 0xb40   : > { %v4529_v46 = vpop.f32.mrb[6].mxu0 }
 0xb41   : > { %v7054_v7 = vpop.f32.mrb[7].mxu0  ;;  %v4530_v14 = vadd.f32 %v6322_v13, %v4529_v46  ;;  %v5470_v46 = vld [vmem:[%s9939_s29 + $0x8] sm:$0xff] }
 0xb42   : > { %v5493_v7 = vand.u32 4294901760, %v5469_v53  ;;  %v5496_v13 = vand.u32 4294901760, %v5470_v46 }
 0xb48   : > { %v4620_v47 = vpop.f32.mrb[8].mxu0 }
 0xb49   : > { %v4621_v57 = vadd.f32 %v4620_v47, %v4530_v14  ;;  %v7065_v34 = vpop.f32.mrb[9].mxu0  ;;  %v5471_v14 = vld [vmem:[%s9939_s29 + $0x10] sm:$0xff]  ;;  %v5472_v47 = vld [vmem:[%s9939_s29 + $0x18] sm:$0xff] }
 0xb4a   : > { %v9577_v34 = vsub.f32 %v5470_v46, %v5496_v13  ;;  %v5482_v46 = vld [vmem:[%s9939_s29 + $0x68] sm:$0xff] }
 0xb50   : > { %v4700_v35 = vpop.f32.mrb[10].mxu0 }
 0xb51   : > { %v4701_v48 = vadd.f32 %v4700_v35, %v4621_v57  ;;  %v7076_v10 = vpop.f32.mrb[11].mxu0  ;;  %v9575_v57 = vsub.f32 %v5469_v53, %v5493_v7  ;;  %v5499_v35 = vand.u32 4294901760, %v5471_v14  ;;  %v5481_v53 = vld [vmem:[%s9939_s29 + $0x60] sm:$0xff] }
 0xb53   : > { %v9579_v10 = vsub.f32 %v5471_v14, %v5499_v35  ;;  %v7747_v26 = vpack.c.bf16 %v9577_v34, %v9575_v57 }
 0xb58   : > { %v4777_v18 = vpop.f32.mrb[12].mxu0 }
 0xb59   : > { %v4778_v28 = vadd.f32 %v4777_v18, %v4701_v48  ;;  %v7087_v49 = vpop.f32.mrb[13].mxu0  ;;  %v5502_v48 = vand.u32 4294901760, %v5472_v47 }
 0xb5a   : > { %v5473_v49 = vld [vmem:[%s9939_s29 + $0x20] sm:$0xff] }
 0xb5b   : > { %v4861_v50 = vadd.f32 %v4860_v38, %v4778_v28  ;;  %v9561_v38 = vpack.c.bf16 %v5085_v20, %v5078_v15  ;;  %v9581_v18 = vsub.f32 %v5472_v47, %v5502_v48  ;;  %v9583_v28 = vpack.c.bf16 %v5496_v13, %v5493_v7  ;;  %v5479_v20 = vld [vmem:[%s9939_s29 + $0x50] sm:$0xff] }
 0xb5c   : > { %v5523_v31 = vand.u32 4294901760, %v5479_v20  ;;  %v5529_v7 = vand.u32 4294901760, %v5481_v53  ;;  %v5532_v13 = vand.u32 4294901760, %v5482_v46 }
 0xb5d   : > { %7700 = vmatpush3.bf16.msra.mxu0 %v9583_v28  ;;  %v7750_v32 = vpack.c.bf16 %v9581_v18, %v9579_v10 }
 0xb5e   : > { %7701 = vmatprep.subr.bf16.mxu0 %v8375_v52  ;;  %v5669_v47 = vsub.f32 %v5481_v53, %v5529_v7 }
 0xb60   : > { %v4935_v39 = vpop.f32.mrb[14].mxu0 }
 0xb61   : > { %v4936_v60 = vadd.f32 %v4935_v39, %v4861_v50  ;;  %v7109_v61 = vpop.f32.mrb[15].mxu0  ;;  %v5474_v50 = vld [vmem:[%s9939_s29 + $0x28] sm:$0xff]  ;;  %v5505_v39 = vand.u32 4294901760, %v5473_v49 }
 0xb63   : > { %v9518_v63 = vadd.f32 %v8086_v62, %v4936_v60  ;;  %v5508_v60 = vand.u32 4294901760, %v5474_v50  ;;  %v9593_v61 = vsub.f32 %v5473_v49, %v5505_v39  ;;  %v5484_v49 = vld [vmem:[%s9939_s29 + $0x78] sm:$0xff] }
 0xb65   : > { %v4940_v2 = vsel %vm1315_vm0, %v9518_v63, 0.0  ;;  %v9595_v62 = vsub.f32 %v5474_v50, %v5508_v60  ;;  %v9611_v51 = vpack.c.bf16 %v5508_v60, %v5505_v39  ;;  %v5538_v60 = vand.u32 4294901760, %v5484_v49 }
 0xb66   : > { %4941 = vadd.xlane.f32.xlu0 %v4940_v2  ;;  %v9597_v2 = vpack.c.bf16 %v5502_v48, %v5499_v35  ;;  %v5676_v35 = vsub.f32 %v5482_v46, %v5532_v13  ;;  %v5483_v48 = vld [vmem:[%s9939_s29 + $0x70] sm:$0xff]  ;;  %v5600_v46 = vand.u32 4294901760, %v9579_v10 }
 0xb67   : > { %v7753_v40 = vpack.c.bf16 %v9595_v62, %v9593_v61  ;;  %v5535_v39 = vand.u32 4294901760, %v5483_v48 }
 0xb68   : > { %7703 = vmatpush3.bf16.msra.mxu0 %v9597_v2  ;;  %v7765_v50 = vpack.c.bf16 %v5676_v35, %v5669_v47 }
 0xb69   : > { %7704 = vmatprep.subr.bf16.mxu0 %v8375_v52 }
 0xb6c   : > { %7706 = vmatpush3.bf16.msra.mxu0 %v9611_v51 }
 0xb6d   : > { %7707 = vmatprep.subr.bf16.mxu0 %v8375_v52 }
 0xb7c   : > { %4959 = vrot.lane.b32.xlu0 %v4957_v16, %s8378_s25  ;;  %v5476_v16 = vld [vmem:[%s9939_s29 + $0x38] sm:$0xff] }
 0xbf3   : > { %v4942_v4 = vpop.xlane.xlu0 %4941 }
 0xbf4   : > { %v4943_v24 = vmul.f32 0.03125, %v4942_v4  ;;  %v5511_v4 = vand.u32 4294901760, %v5475_v3 }
 0xbf6   : > { %v9526_v5 = vsub.f32 %v9518_v63, %v4943_v24  ;;  %v5514_v24 = vand.u32 4294901760, %v5476_v16 }
 0xbf7   : > { %v4960_v12 = vpop.permute.xlu0 %4959 }
 0xbf8   : > { %v4945_v36 = vmul.f32 %v9526_v5, %v9526_v5  ;;  %v9615_v54 = vpack.c.bf16 %v5514_v24, %v5511_v4 }
 0xbfa   : > { %v4946_v41 = vsel %vm1315_vm0, %v4945_v36, 0.0  ;;  %v9607_v36 = vsub.f32 %v5475_v3, %v5511_v4  ;;  %7709 = vmatpush3.bf16.msra.mxu0 %v9615_v54  ;;  %v5690_v4 = vsub.f32 %v5484_v49, %v5538_v60 }
 0xbfb   : > { %4947 = vadd.xlane.f32.xlu1 %v4946_v41  ;;  %v9609_v41 = vsub.f32 %v5476_v16, %v5514_v24  ;;  %7710 = vmatprep.subr.bf16.mxu0 %v8375_v52  ;;  %v5683_v16 = vsub.f32 %v5483_v48, %v5535_v39  ;;  %v5601_v48 = vsub.f32 %v9579_v10, %v5600_v46 }
 0xbfd   : > { %v7756_v29 = vpack.c.bf16 %v9609_v41, %v9607_v36  ;;  %v7768_v24 = vpack.c.bf16 %v5690_v4, %v5683_v16 }
 0xc88   : > { %v4948_v9 = vpop.xlane.xlu1 %4947 }
 0xc89   : > { %v4949_v11 = vmul.f32 0.03125, %v4948_v9  ;;  %v9713_v9 = vpack.c.bf16 %v5532_v13, %v5529_v7  ;;  %v5607_v7 = vand.u32 4294901760, %v9581_v18 }
 0xc8b   : > { %v4950_v23 = vadd.f32 1e-06, %v4949_v11  ;;  %v9718_v11 = vpack.c.bf16 %v5538_v60, %v5535_v39  ;;  %v5608_v49 = vsub.f32 %v9581_v18, %v5607_v7  ;;  %v5621_v39 = vand.u32 4294901760, %v9595_v62 }
 0xc8c   : > { %v5602_v60 = vand.u32 4294901760, %v5601_v48 }
 0xc8d   : > { %8084 = vrsqrt.f32 %v4950_v23  ;;  %v5670_v23 = vand.u32 4294901760, %v5669_v47 }
 0xc97   : > { %v8085_v1 = vpop.eup %8084 }
 0xc98   : > { %v4952_v21 = vmul.f32 %v8085_v1, %v9526_v5  ;;  %v5477_v5 = vld [vmem:[%s9939_s29 + $0x40] sm:$0xff]  ;;  %v5677_v1 = vand.u32 4294901760, %v5676_v35 }
 0xc99   : > { %v5517_v37 = vand.u32 4294901760, %v5477_v5 }
 0xc9a   : > { %v4962_v6 = vmul.f32 %v4960_v12, %v4952_v21  ;;  %v9722_v21 = vpack.c.bf16 %v5677_v1, %v5670_v23  ;;  %v5684_v12 = vand.u32 4294901760, %v5683_v16 }
 0xc9b   : > { %v9676_v42 = vsub.f32 %v5477_v5, %v5517_v37 }
 0xc9c   : > { %v4967_v25 = vadd.f32 %v4966_v27, %v4962_v6  ;;  %v5691_v27 = vand.u32 4294901760, %v5690_v4  ;;  %v5671_v6 = vsub.f32 %v5669_v47, %v5670_v23 }
 0xc9e   : > { %v4980_v30 = vsel %vm1315_vm0, %v4967_v25, 0  ;;  %v5678_v25 = vsub.f32 %v5676_v35, %v5677_v1  ;;  %v5628_v1 = vand.u32 4294901760, %v9607_v36 }
 0xc9f   : > { %v5051_v44 = vand.u32 4294901760, %v4980_v30 }
 0xca1   : > { %v5052_v45 = vsub.f32 %v4980_v30, %v5051_v44  ;;  %v9724_v30 = vpack.c.bf16 %v5691_v27, %v5684_v12 }
 0xca3   : > { %v5053_v55 = vand.u32 4294901760, %v5052_v45 }
 0xca5   : > { %v5054_v58 = vsub.f32 %v5052_v45, %v5053_v55 }
 0xca7   : > { %v5055_v15 = vand.u32 4294901760, %v5054_v58  ;;  %v5692_v58 = vsub.f32 %v5690_v4, %v5691_v27 }
 0xca9   : > { %7119 = vmatmul.mubr.f32.vlgmr.msra.gmra.mrb[16].mxu1 %v5055_v15 }
 0xcaa   : > { %7670 = vmatpush3.bf16.msra.mxu1 %v7669_v22  ;;  %7129 = vmatprep.mubr.msk.f32.mxu1 %vm8376_vm2, %v8374_v0  ;;  %v5480_v22 = vld [vmem:[%s9939_s29 + $0x58] sm:$0xff] }
 0xcab   : > { %7671 = vmatprep.subr.bf16.mxu1 %v8375_v52 }
 0xcae   : > { %7673 = vmatpush3.bf16.msra.mxu1 %v7672_v56  ;;  %v5526_v56 = vand.u32 4294901760, %v5480_v22 }
 0xcaf   : > { %7674 = vmatprep.subr.bf16.mxu1 %v8375_v52 }
 0xcb0   : > { %v9708_v3 = vpack.c.bf16 %v5526_v56, %v5523_v31 }
 0xcb1   : > { %7130 = vmatmul.mubr.f32.vlgmr.msra.gmra.mrb[16].mxu1 %v5051_v44 }
 0xcb2   : > { %7676 = vmatpush3.bf16.msra.mxu1 %v7675_v19  ;;  %7140 = vmatprep.mubr.msk.f32.mxu1 %vm8376_vm2, %v8374_v0 }
 0xcb3   : > { %7677 = vmatprep.subr.bf16.mxu1 %v8375_v52 }
 0xcb6   : > { %7679 = vmatpush3.bf16.msra.mxu1 %v7678_v59  ;;  %v9683_v59 = vsub.f32 %v5479_v20, %v5523_v31 }
 0xcb7   : > { %7680 = vmatprep.subr.bf16.mxu1 %v8375_v52 }
 0xcb9   : > { %7141 = vmatmul.mubr.f32.vlgmr.msra.gmra.mrb[16].mxu1 %v5052_v45  ;;  %v5679_v45 = vand.u32 4294901760, %v5678_v25 }
 0xcba   : > { %7682 = vmatpush3.bf16.msra.mxu1 %v9531_v17  ;;  %7151 = vmatprep.mubr.msk.f32.mxu1 %vm8376_vm2, %v8374_v0 }
 0xcbb   : > { %7683 = vmatprep.subr.bf16.mxu1 %v8375_v52 }
 0xcbe   : > { %7685 = vmatpush3.bf16.msra.mxu1 %v9542_v43 }
 0xcbf   : > { %7686 = vmatprep.subr.bf16.mxu1 %v8375_v52 }
 0xcc1   : > { %7152 = vmatmul.mubr.f32.vlgmr.msra.gmra.mrb[16].mxu1 %v5053_v55  ;;  %v5685_v55 = vsub.f32 %v5683_v16, %v5684_v12  ;;  %v5609_v16 = vand.u32 4294901760, %v5608_v49  ;;  %v5635_v12 = vand.u32 4294901760, %v9609_v41 }
 0xcc2   : > { %7688 = vmatpush3.bf16.msra.mxu1 %v9559_v8  ;;  %7162 = vmatprep.mubr.msk.f32.mxu1 %vm8376_vm2, %v8374_v0  ;;  %v9685_v8 = vsub.f32 %v5480_v22, %v5526_v56  ;;  %v5586_v22 = vand.u32 4294901760, %v9575_v57 }
 0xcc3   : > { %7689 = vmatprep.subr.bf16.mxu1 %v8375_v52  ;;  %v5636_v25 = vsub.f32 %v9609_v41, %v5635_v12 }
 0xcc4   : > { %v5587_v56 = vsub.f32 %v9575_v57, %v5586_v22 }
 0xcc6   : > { %7691 = vmatpush3.bf16.msra.mxu1 %v9561_v38  ;;  %v7762_v38 = vpack.c.bf16 %v9685_v8, %v9683_v59  ;;  %v5588_v47 = vand.u32 4294901760, %v5587_v56 }
 0xcc7   : > { %7692 = vmatprep.subr.bf16.mxu1 %v8375_v52 }
 0xcc9   : > { %7163 = vmatmul.mubr.f32.vlgmr.msra.gmra.mrb[16].mxu1 %v5051_v44 }
 0xcca   : > { %7694 = vmatpush3.bf16.msra.mxu1 %v9531_v17  ;;  %7173 = vmatprep.mubr.msk.f32.mxu1 %vm8376_vm2, %v8374_v0  ;;  %v5478_v17 = vld [vmem:[%s9939_s29 + $0x48] sm:$0xff] }
 0xccb   : > { %7695 = vmatprep.subr.bf16.mxu1 %v8375_v52 }
 0xcce   : > { %7697 = vmatpush3.bf16.msra.mxu1 %v9542_v43  ;;  %v5520_v43 = vand.u32 4294901760, %v5478_v17 }
 0xccf   : > { %7746 = vmatprep.subr.bf16.mxu1 %v8375_v52 }
 0xcd0   : > { %v9678_v33 = vsub.f32 %v5478_v17, %v5520_v43  ;;  %v9698_v14 = vpack.c.bf16 %v5520_v43, %v5517_v37  ;;  %v6323_v17 = vld [vmem:[%s9940_s13] ss:$0 sm:$0xff]  ;;  %s9840_s13 = scalar_lea.hbm %s9942_s22, %s6326_s27 }
 0xcd1   : > { %7174 = vmatmul.mubr.f32.vlgmr.msra.gmra.mrb[16].mxu1 %v5051_v44  ;;  %v5672_v44 = vand.u32 4294901760, %v5671_v6  ;;  %v5629_v6 = vsub.f32 %v9607_v36, %v5628_v1 }
 0xcd2   : > { %7748 = vmatpush3.bf16.msra.mxu1 %v7747_v26  ;;  %7278 = vmatprep.mubr.msk.f32.mxu1 %vm8376_vm2, %v8374_v0  ;;  %v7759_v19 = vpack.c.bf16 %v9678_v33, %v9676_v42  ;;  %v5686_v26 = vand.u32 4294901760, %v5685_v55  ;;  %v5642_v55 = vand.u32 4294901760, %v9676_v42 }
 0xcd3   : > { %7749 = vmatprep.subr.bf16.mxu1 %v8375_v52  ;;  %7712 = vmatpush3.bf16.msra.mxu0 %v9698_v14  ;;  %v9726_v15 = vpack.c.bf16 %v5679_v45, %v5672_v44  ;;  %v7726_v44 = vpack.c.bf16 %v5609_v16, %v5602_v60  ;;  %v5630_v36 = vand.u32 4294901760, %v5629_v6 }
 0xcd4   : > { %7713 = vmatprep.subr.bf16.mxu0 %v8375_v52 }
 0xcd6   : > { %7751 = vmatpush3.bf16.msra.mxu1 %v7750_v32  ;;  %v5693_v32 = vand.u32 4294901760, %v5692_v58  ;;  %v5649_v58 = vand.u32 4294901760, %v9678_v33 }
 0xcd7   : > { %7752 = vmatprep.subr.bf16.mxu1 %v8375_v52  ;;  %7715 = vmatpush3.bf16.msra.mxu0 %v9708_v3 }
 0xcd8   : > { %7716 = vmatprep.subr.bf16.mxu0 %v8375_v52  ;;  %v9728_v5 = vpack.c.bf16 %v5693_v32, %v5686_v26  ;;  %v5637_v26 = vand.u32 4294901760, %v5636_v25  ;;  %v5643_v32 = vsub.f32 %v9676_v42, %v5642_v55 }
 0xcda   : > { %7754 = vmatpush3.bf16.msra.mxu1 %v7753_v40 }
 0xcdb   : > { %7755 = vmatprep.subr.bf16.mxu1 %v8375_v52  ;;  %7718 = vmatpush3.bf16.msra.mxu0 %v9713_v9 }
 0xcdc   : > { %7719 = vmatprep.subr.bf16.mxu0 %v8375_v52 }
 0xcde   : > { %7757 = vmatpush3.bf16.msra.mxu1 %v7756_v29  ;;  %v5593_v29 = vand.u32 4294901760, %v9577_v34 }
 0xcdf   : > { %7758 = vmatprep.subr.bf16.mxu1 %v8375_v52  ;;  %7721 = vmatpush3.bf16.msra.mxu0 %v9718_v11 }
 0xce0   : > { %7722 = vmatprep.subr.bf16.mxu0 %v8375_v52  ;;  %v7795_v53 = vpack.c.bf16 %v5593_v29, %v5586_v22  ;;  %v5644_v22 = vand.u32 4294901760, %v5643_v32 }
 0xce2   : > { %7760 = vmatpush3.bf16.msra.mxu1 %v7759_v19  ;;  %v5594_v19 = vsub.f32 %v9577_v34, %v5593_v29  ;;  %v7798_v34 = vpack.c.bf16 %v5607_v7, %v5600_v46 }
 0xce3   : > { %7761 = vmatprep.subr.bf16.mxu1 %v8375_v52 }
 0xce4   : > { %v5595_v35 = vand.u32 4294901760, %v5594_v19 }
 0xce6   : > { %7763 = vmatpush3.bf16.msra.mxu1 %v7762_v38  ;;  %v7723_v18 = vpack.c.bf16 %v5595_v35, %v5588_v47 }
 0xce7   : > { %7764 = vmatprep.subr.bf16.mxu1 %v8375_v52 }
 0xcea   : > { %7766 = vmatpush3.bf16.msra.mxu1 %v7765_v50  ;;  %v5614_v50 = vand.u32 4294901760, %v9593_v61 }
 0xceb   : > { %7767 = vmatprep.subr.bf16.mxu1 %v8375_v52 }
 0xcec   : > { %v5615_v4 = vsub.f32 %v9593_v61, %v5614_v50  ;;  %v7801_v27 = vpack.c.bf16 %v5621_v39, %v5614_v50 }
 0xcee   : > { %7769 = vmatpush3.bf16.msra.mxu1 %v7768_v24  ;;  %v5622_v24 = vsub.f32 %v9595_v62, %v5621_v39  ;;  %v5616_v45 = vand.u32 4294901760, %v5615_v4  ;;  %v7804_v62 = vpack.c.bf16 %v5635_v12, %v5628_v1 }
 0xcef   : > { %7794 = vmatprep.subr.bf16.mxu1 %v8375_v52 }
 0xcf0   : > { %v5623_v61 = vand.u32 4294901760, %v5622_v24 }
 0xcf2   : > { %v7729_v41 = vpack.c.bf16 %v5623_v61, %v5616_v45 }
 0xda4   : > { %v5463_v40 = vpop.f32.mrb[16].mxu1 }
 0xda5   : > { %v7849_v37 = vadd.f32 %v6323_v17, %v5463_v40  ;;  %v7175_v43 = vpop.f32.mrb[17].mxu1  ;;  %v5650_v17 = vsub.f32 %v9678_v33, %v5649_v58  ;;  %v7807_v40 = vpack.c.bf16 %v5649_v58, %v5642_v55 }
 0xda6   : > { %v5663_v43 = vand.u32 4294901760, %v9685_v8 }
 0xda7   : > { %v5467_v20 = vmax.f32 %v7849_v37, 0.0  ;;  %v5656_v37 = vand.u32 4294901760, %v9683_v59  ;;  %v5651_v29 = vand.u32 4294901760, %v5650_v17 }
 0xda8   : > { %v5664_v42 = vsub.f32 %v9685_v8, %v5663_v43  ;;  %v6324_v8 = vld [vmem:[%s9941_s4] ss:$0 sm:$0xff]  ;;  %s8291_s4 = scalar_lea.vmem %s8290_s10, 256 }
 0xda9   : > { %v5468_v31 = vmul.f32 %v5467_v20, %v5467_v20  ;;  %v7732_v20 = vpack.c.bf16 %v5637_v26, %v5630_v36  ;;  %v7810_v33 = vpack.c.bf16 %v5663_v43, %v5656_v37  ;;  %v7735_v56 = vpack.c.bf16 %v5651_v29, %v5644_v22  ;;  %p8293_p2 = scmp.lt.s32.totalorder %s8291_s4, %s8285_s30 }
 0xdab   : > { %v9737_v38 = vand.u32 4294901760, %v5468_v31  ;;  %p8294_p3 = por %p8293_p2, %p8292_p0 }
 0xdad   : > { %v9742_v13 = vsub.f32 %v5468_v31, %v9737_v38  ;;  %v5657_v31 = vsub.f32 %v9683_v59, %v5656_v37  ;;  %p8295_p10 = pnand %p8294_p3, %p8288_p13 }
 0xdaf   : > { %v5575_v57 = vand.u32 4294901760, %v9742_v13  ;;  %7279 = vmatmul.mubr.f32.vlgmr.msra.gmra.mrb[18].mxu1 %v9742_v13  ;;  %v5658_v19 = vand.u32 4294901760, %v5657_v31 }
 0xdb0   : > { %7796 = vmatpush3.bf16.msra.mxu1 %v7795_v53  ;;  %7348 = vmatprep.mubr.msk.f32.mxu1 %vm8376_vm2, %v8374_v0  ;;  %v5665_v53 = vand.u32 4294901760, %v5664_v42 }
 0xdb1   : > { %7797 = vmatprep.subr.bf16.mxu1 %v8375_v52  ;;  %v5576_v10 = vsub.f32 %v9742_v13, %v5575_v57 }
 0xdb2   : > { %v7738_v46 = vpack.c.bf16 %v5665_v53, %v5658_v19 }
 0xdb3   : > { %v5577_v23 = vand.u32 4294901760, %v5576_v10 }
 0xdb4   : > { %7799 = vmatpush3.bf16.msra.mxu1 %v7798_v34 }
 0xdb5   : > { %7209 = vmatmul.mubr.f32.vlgmr.msra.gmra.mrb[16].mxu0 %v5577_v23  ;;  %7800 = vmatprep.subr.bf16.mxu1 %v8375_v52 }
 0xdb6   : > { %7724 = vmatpush3.bf16.msra.mxu0 %v7723_v18  ;;  %7243 = vmatprep.mubr.msk.f32.mxu0 %vm8376_vm2, %v8374_v0 }
 0xdb7   : > { %7725 = vmatprep.subr.bf16.mxu0 %v8375_v52 }
 0xdb8   : > { %7802 = vmatpush3.bf16.msra.mxu1 %v7801_v27 }
 0xdb9   : > { %7803 = vmatprep.subr.bf16.mxu1 %v8375_v52 }
 0xdba   : > { %7727 = vmatpush3.bf16.msra.mxu0 %v7726_v44 }
 0xdbb   : > { %7728 = vmatprep.subr.bf16.mxu0 %v8375_v52 }
 0xdbc   : > { %7805 = vmatpush3.bf16.msra.mxu1 %v7804_v62 }
 0xdbd   : > { %7806 = vmatprep.subr.bf16.mxu1 %v8375_v52 }
 0xdbe   : > { %7730 = vmatpush3.bf16.msra.mxu0 %v7729_v41 }
 0xdbf   : > { %7731 = vmatprep.subr.bf16.mxu0 %v8375_v52 }
 0xdc0   : > { %7808 = vmatpush3.bf16.msra.mxu1 %v7807_v40 }
 0xdc1   : > { %7809 = vmatprep.subr.bf16.mxu1 %v8375_v52 }
 0xdc2   : > { %7733 = vmatpush3.bf16.msra.mxu0 %v7732_v20 }
 0xdc3   : > { %7734 = vmatprep.subr.bf16.mxu0 %v8375_v52 }
 0xdc4   : > { %7811 = vmatpush3.bf16.msra.mxu1 %v7810_v33 }
 0xdc5   : > { %7812 = vmatprep.subr.bf16.mxu1 %v8375_v52 }
 0xdc6   : > { %7736 = vmatpush3.bf16.msra.mxu0 %v7735_v56 }
 0xdc7   : > { %7737 = vmatprep.subr.bf16.mxu0 %v8375_v52 }
 0xdc8   : > { %7814 = vmatpush3.bf16.msra.mxu1 %v9722_v21 }
 0xdc9   : > { %7815 = vmatprep.subr.bf16.mxu1 %v8375_v52 }
 0xdca   : > { %7739 = vmatpush3.bf16.msra.mxu0 %v7738_v46 }
 0xdcb   : > { %7740 = vmatprep.subr.bf16.mxu0 %v8375_v52 }
 0xdcc   : > { %7817 = vmatpush3.bf16.msra.mxu1 %v9724_v30 }
 0xdce   : > { %7742 = vmatpush3.bf16.msra.mxu0 %v9726_v15 }
 0xdcf   : > { %7349 = vmatmul.mubr.f32.vlgmr.msra.gmra.mrb[20].mxu1 %v9737_v38  ;;  %7743 = vmatprep.subr.bf16.mxu0 %v8375_v52 }
 0xdd2   : > { %7745 = vmatpush3.bf16.msra.mxu0 %v9728_v5 }
 0xdd3   : > { %7770 = vmatprep.subr.bf16.mxu0 %v8375_v52 }
 0xdd5   : > { %7244 = vmatmul.mubr.f32.vlgmr.msra.gmra.mrb[18].mxu0 %v9737_v38 }
 0xdd6   : > { %7772 = vmatpush3.bf16.msra.mxu0 %v9583_v28  ;;  %7313 = vmatprep.mubr.msk.f32.mxu0 %vm8376_vm2, %v8374_v0 }
 0xdd7   : > { %7773 = vmatprep.subr.bf16.mxu0 %v8375_v52 }
 0xdda   : > { %7775 = vmatpush3.bf16.msra.mxu0 %v9597_v2 }
 0xddb   : > { %7776 = vmatprep.subr.bf16.mxu0 %v8375_v52 }
 0xdde   : > { %7778 = vmatpush3.bf16.msra.mxu0 %v9611_v51 }
 0xddf   : > { %7779 = vmatprep.subr.bf16.mxu0 %v8375_v52 }
 0xde2   : > { %7781 = vmatpush3.bf16.msra.mxu0 %v9615_v54 }
 0xde3   : > { %7782 = vmatprep.subr.bf16.mxu0 %v8375_v52 }
 0xde6   : > { %7784 = vmatpush3.bf16.msra.mxu0 %v9698_v14 }
 0xde7   : > { %7785 = vmatprep.subr.bf16.mxu0 %v8375_v52 }
 0xdea   : > { %7787 = vmatpush3.bf16.msra.mxu0 %v9708_v3 }
 0xdeb   : > { %7788 = vmatprep.subr.bf16.mxu0 %v8375_v52 }
 0xdee   : > { %7790 = vmatpush3.bf16.msra.mxu0 %v9713_v9 }
 0xdef   : > { %7791 = vmatprep.subr.bf16.mxu0 %v8375_v52 }
 0xdf2   : > { %7793 = vmatpush3.bf16.msra.mxu0 %v9718_v11 }
 0xdf3   : > { %7818 = vmatprep.subr.bf16.mxu0 %v8375_v52 }
 0xdf5   : > { %7314 = vmatmul.mubr.f32.vlgmr.msra.gmra.mrb[20].mxu0 %v5575_v57 }
 0xdf6   : > { %7820 = vmatpush3.bf16.msra.mxu0 %v9583_v28  ;;  %7383 = vmatprep.mubr.msk.f32.mxu0 %vm8376_vm2, %v8374_v0 }
 0xdf7   : > { %7821 = vmatprep.subr.bf16.mxu0 %v8375_v52 }
 0xdfa   : > { %7823 = vmatpush3.bf16.msra.mxu0 %v9597_v2 }
 0xdfb   : > { %7824 = vmatprep.subr.bf16.mxu0 %v8375_v52 }
 0xdfe   : > { %7826 = vmatpush3.bf16.msra.mxu0 %v9611_v51 }
 0xdff   : > { %7827 = vmatprep.subr.bf16.mxu0 %v8375_v52 }
 0xe02   : > { %7829 = vmatpush3.bf16.msra.mxu0 %v9615_v54 }
 0xe03   : > { %7830 = vmatprep.subr.bf16.mxu0 %v8375_v52 }
 0xe06   : > { %7832 = vmatpush3.bf16.msra.mxu0 %v9698_v14 }
 0xe07   : > { %7833 = vmatprep.subr.bf16.mxu0 %v8375_v52 }
 0xe0a   : > { %7835 = vmatpush3.bf16.msra.mxu0 %v9708_v3 }
 0xe0b   : > { %7836 = vmatprep.subr.bf16.mxu0 %v8375_v52 }
 0xe0e   : > { %7838 = vmatpush3.bf16.msra.mxu0 %v9713_v9 }
 0xe0f   : > { %7839 = vmatprep.subr.bf16.mxu0 %v8375_v52 }
 0xe12   : > { %7841 = vmatpush3.bf16.msra.mxu0 %v9718_v11 }
 0xe15   : > { %7384 = vmatmul.mubr.f32.vlgmr.msra.gmra.mrb[22].mxu0 %v9737_v38 }
 0xe82   : > { %v5834_v0 = vpop.f32.mrb[18].mxu1 }
 0xe83   : > { %v7280_v28 = vpop.f32.mrb[19].mxu1 }
 0xe88   : > { %v5579_v2 = vpop.f32.mrb[16].mxu0 }
 0xe89   : > { %v7210_v51 = vpop.f32.mrb[17].mxu0  ;;  %v5580_v14 = vadd.f32 %v6324_v8, %v5579_v2 }
 0xea2   : > { %v6042_v54 = vpop.f32.mrb[20].mxu1 }
 0xea3   : > { %v7350_v59 = vpop.f32.mrb[21].mxu1 }
 0xea8   : > { %v5730_v3 = vpop.f32.mrb[18].mxu0 }
 0xea9   : > { %v5731_v9 = vadd.f32 %v5730_v3, %v5580_v14  ;;  %v7245_v52 = vpop.f32.mrb[19].mxu0 }
 0xeab   : > { %v5835_v11 = vadd.f32 %v5834_v0, %v5731_v9 }
 0xec8   : > { %v5923_v21 = vpop.f32.mrb[20].mxu0 }
 0xec9   : > { %v5924_v30 = vadd.f32 %v5923_v21, %v5835_v11  ;;  %v7315_v15 = vpop.f32.mrb[21].mxu0 }
 0xecb   : > { %v6043_v5 = vadd.f32 %v6042_v54, %v5924_v30 }
 0xee8   : > { %v6129_v38 = vpop.f32.mrb[22].mxu0 }
 0xee9   : > { %v6130_v7 = vadd.f32 %v6129_v38, %v6043_v5  ;;  %v7385_v13 = vpop.f32.mrb[23].mxu0 }
 0xeeb   : > { %v6133_v47 = vadd.f32 %v6130_v7, %v9518_v63 }
 0xeed   : > { %6134 = vst.msk [vmem:[%s616_s9] sm:$0xff] %vm1315_vm0, %v6133_v47 }
 0xeee   : > { %8298 = shalt.err (!%p8295_p10)
}
 0xeef   : > { %s8299_s5 = scalar_lea.hbm %s9840_s13, 128  ;;  %s8303_s25 = scalar_lea.hbm %s9942_s22, 256 }
 0xef0   : > { %p8300_p4 = scmp.ne.s32.totalorder %s9840_s13, %s8299_s5  ;;  %p8304_p5 = scmp.lt.u32.totalorder %s9840_s13, %s9942_s22 }
 0xef1   : > { %p8305_p7 = scmp.lt.u32.totalorder %s8303_s25, %s8299_s5  ;;  %p8307_p9 = scmp.lt.u32.totalorder %s8299_s5, %s9840_s13 }
 0xef2   : > { %p8301_p11 = pnand %p8300_p4, %p9943_p12 }
 0xef3   : > { %p8306_p6 = por %p8305_p7, %p8304_p5 }
 0xef4   : > { %p8302_p8 = pneg %p8301_p11 }
 0xef5   : > { %p8308_p1 = por %p8307_p9, %p8306_p6 }
 0xef7   : > { %p8309_p13 = pnand %p8308_p1, %p8302_p8 }
 0xef9   : > { %8312 = shalt.err (!%p8309_p13)
}
 0xefa   : > { %7974 = dma.vmem_to_hbm [thread:$0]  (%p9943_p12), %s9842_s15, 128, %s9840_s13, %s6136_s24  }
 0xefb PF: > { %s6161_s30 = sand.u32 1, %s8351_s18   ;;  %p9944_p0 = scmp.ne.s32.totalorder %s9926_s23, 0 }
 0xefc   : > { %p9945_p2 = scmp.ge.s32.totalorder %s8363_s21, 2  ;;  %s6162_s10 = scalar_lea.sflag [#allocation4], %s6161_s30 }
 0xefe   : > { %p8000_p3 = pnand %p9945_p2, %p9944_p0 }
 0xf00   : > { %8346 = dma.done.wait (!%p8000_p3), %s6162_s10, 128  }
 0xf01   : > { %8348 = vsyncadd (!%p8000_p3), %s6162_s10, 4294967168  ;;  %p31_p10 = scmp.ge.s32.totalorder %s8661_s28, 4   ;;  %s9946_s18 = smov %s8355_s19 }
 0xf02   : > { %s9947_s19 = smov %s8359_s20  ;;  %s9948_s20 = smov %s8672_s16 }
 0xf03   : > { %s9949_s21 = smov %s8661_s28  ;;  %33 = sbr.rel (!%p31_p10) target bundleno = 17 (0x11), region = 155 }
 0xf0a   :  { %6167 = vsyncpa [#allocation3], 1 }
 0xf0b   :  { %6169 = vsyncpa [#allocation3 + $0x1], 1 }
 0xf0c   :  { %6170 = vsyncpa [#allocation6], 1 }
 0xf0d   :  { %6171 = vsyncpa [#allocation9], 1 }
 0xf0e   :  { %6172 = vsyncpa [#allocation12], 1 }
 0xf0f   :  { %6173 = vsyncpa [#allocation4], 1 }
 0xf10   :  { %6175 = vsyncpa [#allocation4 + $0x1], 1 }

</bundles_post_ra>
